<compile_context>
chip_gen: v7x
topology: tpu7x:2x2x1
jax: 0.10.0
libtpu: 0.0.40
codegen_flags: <defaults>
</compile_context>

<pallas_src>
import math

import jax
import jax.numpy as jnp
from jax import lax
from jax.experimental import pallas as pl
from jax.experimental.pallas import tpu as pltpu


def _make_kernel(TH, W, H, nH):
    """Build the per-row-block kernel for a fixed (TH, W, H) tiling."""
    L = TH * W

    def kernel(x_ref, xh_ref,
               w1_ref, b1_ref, w2_ref, b2_ref, w3_ref, b3_ref,
               im1_ref, im2_ref, im3_ref, ml_ref, mr_ref,
               out_ref, nh0_ref, nh1_ref, nh2_ref,
               top_ref, bot_ref, sem):
        n = pl.program_id(0)
        i = pl.program_id(1)

        # ---- kick off the two 1-row halo fetches early (row indices clamped; rows that
        # ---- fall outside the image are zeroed later via validity flags).
        row_top = jnp.maximum(i * TH - 1, 0)
        row_bot = jnp.minimum((i + 1) * TH, H - 1)
        top_cp = pltpu.make_async_copy(
            xh_ref.at[pl.ds(n, 1), :, pl.ds(row_top, 1), :], top_ref, sem.at[0])
        bot_cp = pltpu.make_async_copy(
            xh_ref.at[pl.ds(n, 1), :, pl.ds(row_bot, 1), :], bot_ref, sem.at[1])
        top_cp.start()
        bot_cp.start()

        x = x_ref[0]                       # (Cin, L)  identity (unmasked)
        im1 = im1_ref[...]                 # (Cin, 1)
        im2 = im2_ref[...]                 # (width, 1)
        im3 = im3_ref[...]                 # (width, 1)
        w1 = w1_ref[...]                   # (width, Cin)   om1 * bn1 scale folded in
        b1 = b1_ref[...]                   # (width, 1)     bn1 shift

        # ---- conv1 (1x1, dhs mode_op=2): real_input = x*im1, new_history = real_input ----
        xm = x * im1
        nh0_ref[0] = xm.astype(nh0_ref.dtype)
        h1 = jnp.maximum(
            jnp.dot(w1, xm, preferred_element_type=jnp.float32) + b1, 0.0)   # (width, L)
        x2 = h1 * im2                      # conv2's real_input
        nh1_ref[0] = x2.astype(nh1_ref.dtype)

        # ---- conv1 on the halo rows (needed by conv2's dy = +-1 taps) ----
        top_cp.wait()
        bot_cp.wait()
        tflag = (i > 0).astype(jnp.float32)
        bflag = (i < nH - 1).astype(jnp.float32)
        xt = top_ref[0, :, 0, :]           # (Cin, W)
        xb = bot_ref[0, :, 0, :]
        h1t = jnp.maximum(
            jnp.dot(w1, xt * im1, preferred_element_type=jnp.float32) + b1, 0.0)
        h1b = jnp.maximum(
            jnp.dot(w1, xb * im1, preferred_element_type=jnp.float32) + b1, 0.0)
        x2t = h1t * im2 * tflag            # zero outside the image (conv2 zero padding)
        x2b = h1b * im2 * bflag

        # ---- conv2 (3x3, pad 1): im2col of all nine taps into one (9*width, L) matmul ----
        width = x2.shape[0]
        zpad = jnp.zeros((width, 1), jnp.float32)
        # ext lanes: [0, top row (W), main rows (L), bottom row (W), 0]
        ext = jnp.concatenate([zpad, x2t, x2, x2b, zpad], axis=1)   # (width, L + 2W + 2)
        mask_l = ml_ref[...]               # (1, L): 0 where w == 0     (dx = -1 tap)
        mask_r = mr_ref[...]               # (1, L): 0 where w == W-1   (dx = +1 tap)
        patches = []
        for dy in range(3):
            for dx in range(3):
                s = dy * W + dx            # lane offset of tap (dy, dx) inside ext
                p = ext[:, s:s + L]
                if dx == 0:
                    p = p * mask_l
                elif dx == 2:
                    p = p * mask_r
                patches.append(p)
        ops = jnp.concatenate(patches, axis=0)                      # (9*width, L)
        h2 = jnp.maximum(
            jnp.dot(w2_ref[...], ops, preferred_element_type=jnp.float32) + b2_ref[...],
            0.0)                                                    # (width, L)
        x3 = h2 * im3
        nh2_ref[0] = x3.astype(nh2_ref.dtype)

        # ---- conv3 (1x1) + residual + relu (downsample0 is None) ----
        h3 = jnp.dot(w3_ref[...], x3, preferred_element_type=jnp.float32) + b3_ref[...]
        out_ref[0] = jnp.maximum(h3 + x, 0.0).astype(out_ref.dtype)

    return kernel


def _pick_row_tile(H, W, max_lanes=4096):
    """Largest TH dividing H with TH*W a multiple of 128 and at most max_lanes lanes."""
    best = None
    for th in range(1, H + 1):
        if H % th == 0 and (th * W) % 128 == 0 and th * W <= max_lanes:
            best = th
    # Fall back to the full spatial extent (block == full dim is always legal).
    return best if best is not None else H


def bottleneck_forward(x_nchw, params, row_tile=None, store_dtype=jnp.float32):
    """Bottleneck forward. NCHW in / NCHW out, no layout transposes.

    Returns (out, [nh0, nh1, nh2, None]) like the PyTorch module.
    store_dtype: dtype of the four HBM outputs (bf16 halves write traffic on v6e/v7x).
    """
    N, Cin, H, W = x_nchw.shape
    w1, w2, w3 = params["w1"], params["w2"], params["w3"]
    width = w1.shape[0]
    Cout = w3.shape[0]
    if Cin != Cout:
        raise ValueError("downsample0 is None => requires inplanes == planes*expansion "
                         f"(got Cin={Cin}, Cout={Cout})")
    if w2.shape != (width, width, 3, 3):
        raise ValueError(f"unexpected conv2 weight shape {w2.shape}")

    TH = row_tile if row_tile is not None else _pick_row_tile(H, W)
    assert H % TH == 0 and ((TH * W) % 128 == 0 or TH == H), "bad row tile"
    nH = H // TH
    L = TH * W
    f32 = jnp.float32

    # Fold output-channel masks + BN scale into the conv weights, BN shift into a bias.
    s1 = (params["om1"] * params["bn1s"]).astype(f32)
    s2 = (params["om2"] * params["bn2s"]).astype(f32)
    s3 = (params["om3"] * params["bn3s"]).astype(f32)
    w1f = w1.astype(f32) * s1[:, None]                                   # (width, Cin)
    b1 = params["bn1b"].reshape(width, 1).astype(f32)
    # (O, I, 3, 3) -> (O, 3, 3, I) -> (O, 9*I); column group k = dy*3+dx matches the kernel.
    w2f = (jnp.transpose(w2.astype(f32), (0, 2, 3, 1)).reshape(width, 9 * width)
           * s2[:, None])                                                # (width, 9*width)
    b2 = params["bn2b"].reshape(width, 1).astype(f32)
    w3f = w3.astype(f32) * s3[:, None]                                   # (Cout, width)
    b3 = params["bn3b"].reshape(Cout, 1).astype(f32)
    im1 = params["im1"].reshape(Cin, 1).astype(f32)
    im2 = params["im2"].reshape(width, 1).astype(f32)
    im3 = params["im3"].reshape(width, 1).astype(f32)

    # Column masks for the dx = -1 / +1 taps (per-lane, identical for every row block).
    wcol = jnp.tile(jnp.arange(W, dtype=jnp.int32), TH).reshape(1, L)
    mask_l = (wcol != 0).astype(f32)
    mask_r = (wcol != W - 1).astype(f32)

    x4d = x_nchw.astype(f32)
    x2d = x4d.reshape(N, Cin, H * W)       # free reshape, stays C-major (NCHW)

    blk = lambda C: pl.BlockSpec((1, C, L), lambda n, i: (n, 0, i))
    rep = lambda a: pl.BlockSpec(a.shape, lambda n, i: (0,) * a.ndim)

    kernel = _make_kernel(TH, W, H, nH)
    out2d, nh0, nh1, nh2 = pl.pallas_call(
        kernel,
        grid=(N, nH),
        in_specs=[
            blk(Cin),                                   # x, row-blocked, auto-pipelined
            pl.BlockSpec(memory_space=pl.ANY),          # x again (HBM) for the halo DMAs
            rep(w1f), rep(b1), rep(w2f), rep(b2), rep(w3f), rep(b3),
            rep(im1), rep(im2), rep(im3), rep(mask_l), rep(mask_r),
        ],
        out_specs=(blk(Cout), blk(Cin), blk(width), blk(width)),
        out_shape=(
            jax.ShapeDtypeStruct((N, Cout, H * W), store_dtype),   # out
            jax.ShapeDtypeStruct((N, Cin, H * W), store_dtype),    # nh0 = x*im1
            jax.ShapeDtypeStruct((N, width, H * W), store_dtype),  # nh1 = conv2 real_input
            jax.ShapeDtypeStruct((N, width, H * W), store_dtype),  # nh2 = conv3 real_input
        ),
        scratch_shapes=[
            pltpu.VMEM((1, Cin, 1, W), f32),            # top halo row
            pltpu.VMEM((1, Cin, 1, W), f32),            # bottom halo row
            pltpu.SemaphoreType.DMA((2,)),
        ],
        compiler_params=pltpu.CompilerParams(
            dimension_semantics=("parallel", "parallel"),
            vmem_limit_bytes=32 * 1024 * 1024),
    )(x2d, x4d, w1f, b1, w2f, b2, w3f, b3, im1, im2, im3, mask_l, mask_r)

    rs = lambda a: a.reshape(N, a.shape[1], H, W)       # free reshape back to NCHW
    return rs(out2d), [rs(nh0), rs(nh1), rs(nh2), None]


def _ref_bottleneck(x, p):
    """Pure-JAX NCHW reference with identical semantics."""
    hi = lax.Precision.HIGHEST
    dn = ("NCHW", "OIHW", "NCHW")
    bc = lambda v: v.reshape(1, -1, 1, 1)

    xm = x * bc(p["im1"])
    nh0 = xm
    h1 = lax.conv_general_dilated(xm, p["w1"][:, :, None, None], (1, 1), "VALID",
                                  dimension_numbers=dn, precision=hi)
    h1 = h1 * bc(p["om1"]) * bc(p["bn1s"]) + bc(p["bn1b"])
    h1 = jnp.maximum(h1, 0.0)

    x2 = h1 * bc(p["im2"])
    nh1 = x2
    h2 = lax.conv_general_dilated(x2, p["w2"], (1, 1), ((1, 1), (1, 1)),
                                  dimension_numbers=dn, precision=hi)
    h2 = h2 * bc(p["om2"]) * bc(p["bn2s"]) + bc(p["bn2b"])
    h2 = jnp.maximum(h2, 0.0)

    x3 = h2 * bc(p["im3"])
    nh2 = x3
    h3 = lax.conv_general_dilated(x3, p["w3"][:, :, None, None], (1, 1), "VALID",
                                  dimension_numbers=dn, precision=hi)
    h3 = h3 * bc(p["om3"]) * bc(p["bn3s"]) + bc(p["bn3b"])

    out = jnp.maximum(h3 + x, 0.0)
    return out, [nh0, nh1, nh2, None]


def _dhs_mask(C, num_filters_list, signal):
    """sum_i signal[i] * [c < C*num_filters_list[i]//64]  -> shape (C,)."""
    idx = jnp.arange(C)
    book = jnp.stack([(idx < (C * nf // 64)).astype(jnp.float32)
                      for nf in num_filters_list])        # (levels, C)
    return jnp.sum(book * signal[:, None], axis=0)


if __name__ == "__main__":
    key = jax.random.PRNGKey(0)
    N, H, W = 2, 16, 16
    inplanes, planes, groups, base_width, expansion = 16, 4, 1, 64, 4
    width = int(planes * (base_width / 64.0)) * groups    # 4
    Cout = planes * expansion                             # 16 == inplanes -> no downsample
    num_filters_list = [64, 48, 32, 16]
    signal = jnp.zeros((len(num_filters_list),), jnp.float32).at[1].set(1.0)  # select 48/64

    ks = jax.random.split(key, 8)
    x_nchw = jax.random.normal(ks[0], (N, inplanes, H, W), jnp.float32)
    w1 = jax.random.normal(ks[1], (width, inplanes), jnp.float32) / math.sqrt(inplanes)
    w2 = jax.random.normal(ks[2], (width, width, 3, 3), jnp.float32) / math.sqrt(9 * width)
    w3 = jax.random.normal(ks[3], (Cout, width), jnp.float32) / math.sqrt(width)

    def bn_params(k, C):
        k1, k2, k3, k4 = jax.random.split(k, 4)
        gamma = jax.random.uniform(k1, (C,), jnp.float32, 0.5, 1.5)
        beta = 0.1 * jax.random.normal(k2, (C,), jnp.float32)
        mean = 0.1 * jax.random.normal(k3, (C,), jnp.float32)
        var = jax.random.uniform(k4, (C,), jnp.float32, 0.5, 1.5)
        scale = gamma / jnp.sqrt(var + 1e-5)
        shift = beta - mean * scale
        return scale, shift

    bn1s, bn1b = bn_params(ks[4], width)
    bn2s, bn2b = bn_params(ks[5], width)
    bn3s, bn3b = bn_params(ks[6], Cout)

    params = dict(
        w1=w1, w2=w2, w3=w3,
        bn1s=bn1s, bn1b=bn1b, bn2s=bn2s, bn2b=bn2b, bn3s=bn3s, bn3b=bn3b,
        im1=_dhs_mask(inplanes, num_filters_list, signal),
        om1=_dhs_mask(width, num_filters_list, signal),
        im2=_dhs_mask(width, num_filters_list, signal),
        om2=_dhs_mask(width, num_filters_list, signal),
        im3=_dhs_mask(width, num_filters_list, signal),
        om3=_dhs_mask(Cout, num_filters_list, signal),
    )

    # row_tile=8 -> grid (2, 2): exercises the pipelined row blocks AND the halo DMA path.
    out, new_hist = bottleneck_forward(x_nchw, params, row_tile=8)
    jax.block_until_ready(out)
    for h in new_hist[:3]:
        jax.block_until_ready(h)

    ref_out, ref_hist = _ref_bottleneck(x_nchw, params)
    assert bool(jnp.allclose(out, ref_out, atol=2e-2, rtol=2e-2)), "output mismatch"
    for a, b in zip(new_hist[:3], ref_hist[:3]):
        assert bool(jnp.allclose(a, b, atol=2e-2, rtol=2e-2)), "history mismatch"
    assert new_hist[3] is None

    print("KERNEL_OK")
</pallas_src>

<mosaic_0001>
module attributes {stable_mosaic.version = 11 : i64} {
  func.func @kernel(%arg0: i32, %arg1: i32, %arg2: memref<1x16x128xf32, #tpu.memory_space<vmem>>, %arg3: memref<2x16x16x16xf32, #tpu.memory_space<any>>, %arg4: memref<4x16xf32, #tpu.memory_space<vmem>>, %arg5: memref<4x1xf32, #tpu.memory_space<vmem>>, %arg6: memref<4x36xf32, #tpu.memory_space<vmem>>, %arg7: memref<4x1xf32, #tpu.memory_space<vmem>>, %arg8: memref<16x4xf32, #tpu.memory_space<vmem>>, %arg9: memref<16x1xf32, #tpu.memory_space<vmem>>, %arg10: memref<16x1xf32, #tpu.memory_space<vmem>>, %arg11: memref<4x1xf32, #tpu.memory_space<vmem>>, %arg12: memref<4x1xf32, #tpu.memory_space<vmem>>, %arg13: memref<1x128xf32, #tpu.memory_space<vmem>>, %arg14: memref<1x128xf32, #tpu.memory_space<vmem>>, %arg15: memref<1x16x128xf32, #tpu.memory_space<vmem>>, %arg16: memref<1x16x128xf32, #tpu.memory_space<vmem>>, %arg17: memref<1x4x128xf32, #tpu.memory_space<vmem>>, %arg18: memref<1x4x128xf32, #tpu.memory_space<vmem>>, %arg19: memref<1x16x1x16xf32, #tpu.memory_space<vmem>>, %arg20: memref<1x16x1x16xf32, #tpu.memory_space<vmem>>, %arg21: memref<2x!tpu.dma_semaphore, #tpu.memory_space<semaphore_mem>>) attributes {dimension_semantics = [#tpu.dimension_semantics<parallel>, #tpu.dimension_semantics<parallel>], iteration_bounds = array<i64: 2, 2>, scalar_prefetch = 0 : i64, scratch_operands = 3 : i64, tpu.core_type = #tpu.core_type<tc>, window_params = [{transform_indices = @transform_0, window_bounds = array<i64: 1, 16, 128>}, {}, {pipeline_mode = #tpu.pipeline_mode<synchronous>, transform_indices = @transform_2, window_bounds = array<i64: 4, 16>}, {pipeline_mode = #tpu.pipeline_mode<synchronous>, transform_indices = @transform_3, window_bounds = array<i64: 4, 1>}, {pipeline_mode = #tpu.pipeline_mode<synchronous>, transform_indices = @transform_4, window_bounds = array<i64: 4, 36>}, {pipeline_mode = #tpu.pipeline_mode<synchronous>, transform_indices = @transform_5, window_bounds = array<i64: 4, 1>}, {pipeline_mode = #tpu.pipeline_mode<synchronous>, transform_indices = @transform_6, window_bounds = array<i64: 16, 4>}, {pipeline_mode = #tpu.pipeline_mode<synchronous>, transform_indices = @transform_7, window_bounds = array<i64: 16, 1>}, {pipeline_mode = #tpu.pipeline_mode<synchronous>, transform_indices = @transform_8, window_bounds = array<i64: 16, 1>}, {pipeline_mode = #tpu.pipeline_mode<synchronous>, transform_indices = @transform_9, window_bounds = array<i64: 4, 1>}, {pipeline_mode = #tpu.pipeline_mode<synchronous>, transform_indices = @transform_10, window_bounds = array<i64: 4, 1>}, {pipeline_mode = #tpu.pipeline_mode<synchronous>, transform_indices = @transform_11, window_bounds = array<i64: 1, 128>}, {pipeline_mode = #tpu.pipeline_mode<synchronous>, transform_indices = @transform_12, window_bounds = array<i64: 1, 128>}, {transform_indices = @transform_13, window_bounds = array<i64: 1, 16, 128>}, {transform_indices = @transform_14, window_bounds = array<i64: 1, 16, 128>}, {transform_indices = @transform_15, window_bounds = array<i64: 1, 4, 128>}, {transform_indices = @transform_16, window_bounds = array<i64: 1, 4, 128>}]} {
    %c8_i32 = arith.constant 8 : i32
    %0 = arith.muli %arg1, %c8_i32 : i32
    %c1_i32 = arith.constant 1 : i32
    %1 = arith.subi %0, %c1_i32 : i32
    %c0_i32 = arith.constant 0 : i32
    %2 = arith.maxsi %1, %c0_i32 : i32
    %c1_i32_0 = arith.constant 1 : i32
    %3 = arith.addi %arg1, %c1_i32_0 : i32
    %c8_i32_1 = arith.constant 8 : i32
    %4 = arith.muli %3, %c8_i32_1 : i32
    %c15_i32 = arith.constant 15 : i32
    %5 = arith.minsi %4, %c15_i32 : i32
    %c0_i32_2 = arith.constant 0 : i32
    %c0_i32_3 = arith.constant 0 : i32
    %c0_i32_4 = arith.constant 0 : i32
    %6 = tpu.memref_slice %arg3[%arg0, %c0_i32_3, %2, %c0_i32_4] : memref<2x16x16x16xf32, #tpu.memory_space<any>> -> memref<1x16x1x16xf32, #tpu.memory_space<any>>
    %7 = tpu.memref_slice %arg21[%c0_i32_2] : memref<2x!tpu.dma_semaphore, #tpu.memory_space<semaphore_mem>> -> memref<1x!tpu.dma_semaphore, #tpu.memory_space<semaphore_mem>>
    %8 = tpu.memref_squeeze %7 : memref<1x!tpu.dma_semaphore, #tpu.memory_space<semaphore_mem>> -> memref<!tpu.dma_semaphore, #tpu.memory_space<semaphore_mem>>
    tpu.enqueue_dma source(%6 : memref<1x16x1x16xf32, #tpu.memory_space<any>>) target(%arg19 : memref<1x16x1x16xf32, #tpu.memory_space<vmem>>) target_semaphore(%8 : memref<!tpu.dma_semaphore, #tpu.memory_space<semaphore_mem>>)
    %c1_i32_5 = arith.constant 1 : i32
    %c0_i32_6 = arith.constant 0 : i32
    %c0_i32_7 = arith.constant 0 : i32
    %9 = tpu.memref_slice %arg3[%arg0, %c0_i32_6, %5, %c0_i32_7] : memref<2x16x16x16xf32, #tpu.memory_space<any>> -> memref<1x16x1x16xf32, #tpu.memory_space<any>>
    %10 = tpu.memref_slice %arg21[%c1_i32_5] : memref<2x!tpu.dma_semaphore, #tpu.memory_space<semaphore_mem>> -> memref<1x!tpu.dma_semaphore, #tpu.memory_space<semaphore_mem>>
    %11 = tpu.memref_squeeze %10 : memref<1x!tpu.dma_semaphore, #tpu.memory_space<semaphore_mem>> -> memref<!tpu.dma_semaphore, #tpu.memory_space<semaphore_mem>>
    tpu.enqueue_dma source(%9 : memref<1x16x1x16xf32, #tpu.memory_space<any>>) target(%arg20 : memref<1x16x1x16xf32, #tpu.memory_space<vmem>>) target_semaphore(%11 : memref<!tpu.dma_semaphore, #tpu.memory_space<semaphore_mem>>)
    %c0 = arith.constant 0 : index
    %c0_8 = arith.constant 0 : index
    %c0_9 = arith.constant 0 : index
    %12 = vector.load %arg2[%c0, %c0_8, %c0_9] : memref<1x16x128xf32, #tpu.memory_space<vmem>>, vector<1x16x128xf32>
    %13 = vector.shape_cast %12 : vector<1x16x128xf32> to vector<16x128xf32>
    %c0_10 = arith.constant 0 : index
    %c0_11 = arith.constant 0 : index
    %14 = vector.load %arg10[%c0_10, %c0_11] : memref<16x1xf32, #tpu.memory_space<vmem>>, vector<16x1xf32>
    %c0_12 = arith.constant 0 : index
    %c0_13 = arith.constant 0 : index
    %15 = vector.load %arg11[%c0_12, %c0_13] : memref<4x1xf32, #tpu.memory_space<vmem>>, vector<4x1xf32>
    %c0_14 = arith.constant 0 : index
    %c0_15 = arith.constant 0 : index
    %16 = vector.load %arg12[%c0_14, %c0_15] : memref<4x1xf32, #tpu.memory_space<vmem>>, vector<4x1xf32>
    %c0_16 = arith.constant 0 : index
    %c0_17 = arith.constant 0 : index
    %17 = vector.load %arg4[%c0_16, %c0_17] : memref<4x16xf32, #tpu.memory_space<vmem>>, vector<4x16xf32>
    %c0_18 = arith.constant 0 : index
    %c0_19 = arith.constant 0 : index
    %18 = vector.load %arg5[%c0_18, %c0_19] : memref<4x1xf32, #tpu.memory_space<vmem>>, vector<4x1xf32>
    %19 = vector.broadcast %14 : vector<16x1xf32> to vector<16x128xf32>
    %20 = arith.mulf %13, %19 : vector<16x128xf32>
    %c0_20 = arith.constant 0 : index
    %c0_21 = arith.constant 0 : index
    %c0_22 = arith.constant 0 : index
    %21 = vector.load %arg16[%c0_20, %c0_21, %c0_22] : memref<1x16x128xf32, #tpu.memory_space<vmem>>, vector<1x16x128xf32>
    %22 = vector.shape_cast %21 : vector<1x16x128xf32> to vector<16x128xf32>
    %23 = vector.shape_cast %20 : vector<16x128xf32> to vector<1x16x128xf32>
    tpu.vector_store %arg16[%c0_20, %c0_21, %c0_22], %23 {strides = array<i32>} : memref<1x16x128xf32, #tpu.memory_space<vmem>>, vector<1x16x128xf32>,
    %cst = arith.constant dense<0.000000e+00> : vector<4x128xf32>
    %24 = tpu.matmul %17, %20, %cst {dimension_numbers = #tpu.dot_dimension_numbers<[1], [0], [0], [1], [0, 0, 1, 1], [], []>} : vector<4x16xf32>, vector<16x128xf32>, vector<4x128xf32> -> vector<4x128xf32>
    %25 = vector.broadcast %18 : vector<4x1xf32> to vector<4x128xf32>
    %26 = arith.addf %24, %25 : vector<4x128xf32>
    %cst_23 = arith.constant 0.000000e+00 : f32
    %27 = vector.broadcast %cst_23 : f32 to vector<4x128xf32>
    %28 = arith.maximumf %26, %27 : vector<4x128xf32>
    %29 = vector.broadcast %15 : vector<4x1xf32> to vector<4x128xf32>
    %30 = arith.mulf %28, %29 : vector<4x128xf32>
    %c0_24 = arith.constant 0 : index
    %c0_25 = arith.constant 0 : index
    %c0_26 = arith.constant 0 : index
    %31 = vector.load %arg17[%c0_24, %c0_25, %c0_26] : memref<1x4x128xf32, #tpu.memory_space<vmem>>, vector<1x4x128xf32>
    %32 = vector.shape_cast %31 : vector<1x4x128xf32> to vector<4x128xf32>
    %33 = vector.shape_cast %30 : vector<4x128xf32> to vector<1x4x128xf32>
    tpu.vector_store %arg17[%c0_24, %c0_25, %c0_26], %33 {strides = array<i32>} : memref<1x4x128xf32, #tpu.memory_space<vmem>>, vector<1x4x128xf32>,
    %c0_i32_27 = arith.constant 0 : i32
    %c0_i32_28 = arith.constant 0 : i32
    %c0_i32_29 = arith.constant 0 : i32
    %34 = tpu.memref_slice %arg3[%arg0, %c0_i32_28, %2, %c0_i32_29] : memref<2x16x16x16xf32, #tpu.memory_space<any>> -> memref<1x16x1x16xf32, #tpu.memory_space<any>>
    %35 = tpu.memref_slice %arg21[%c0_i32_27] : memref<2x!tpu.dma_semaphore, #tpu.memory_space<semaphore_mem>> -> memref<1x!tpu.dma_semaphore, #tpu.memory_space<semaphore_mem>>
    %36 = tpu.memref_squeeze %35 : memref<1x!tpu.dma_semaphore, #tpu.memory_space<semaphore_mem>> -> memref<!tpu.dma_semaphore, #tpu.memory_space<semaphore_mem>>
    tpu.wait_dma2 semaphore(%36 : memref<!tpu.dma_semaphore, #tpu.memory_space<semaphore_mem>>) src(%34 : memref<1x16x1x16xf32, #tpu.memory_space<any>>) dst(%arg19 : memref<1x16x1x16xf32, #tpu.memory_space<vmem>>)
    %c1_i32_30 = arith.constant 1 : i32
    %c0_i32_31 = arith.constant 0 : i32
    %c0_i32_32 = arith.constant 0 : i32
    %37 = tpu.memref_slice %arg3[%arg0, %c0_i32_31, %5, %c0_i32_32] : memref<2x16x16x16xf32, #tpu.memory_space<any>> -> memref<1x16x1x16xf32, #tpu.memory_space<any>>
    %38 = tpu.memref_slice %arg21[%c1_i32_30] : memref<2x!tpu.dma_semaphore, #tpu.memory_space<semaphore_mem>> -> memref<1x!tpu.dma_semaphore, #tpu.memory_space<semaphore_mem>>
    %39 = tpu.memref_squeeze %38 : memref<1x!tpu.dma_semaphore, #tpu.memory_space<semaphore_mem>> -> memref<!tpu.dma_semaphore, #tpu.memory_space<semaphore_mem>>
    tpu.wait_dma2 semaphore(%39 : memref<!tpu.dma_semaphore, #tpu.memory_space<semaphore_mem>>) src(%37 : memref<1x16x1x16xf32, #tpu.memory_space<any>>) dst(%arg20 : memref<1x16x1x16xf32, #tpu.memory_space<vmem>>)
    %c0_i32_33 = arith.constant 0 : i32
    %40 = arith.cmpi sgt, %arg1, %c0_i32_33 : i32
    %41 = arith.extui %40 : i1 to i32
    %42 = arith.sitofp %41 : i32 to f32
    %c1_i32_34 = arith.constant 1 : i32
    %43 = arith.cmpi slt, %arg1, %c1_i32_34 : i32
    %44 = arith.extui %43 : i1 to i32
    %45 = arith.sitofp %44 : i32 to f32
    %c0_35 = arith.constant 0 : index
    %c0_36 = arith.constant 0 : index
    %c0_37 = arith.constant 0 : index
    %c0_38 = arith.constant 0 : index
    %46 = vector.load %arg19[%c0_35, %c0_36, %c0_37, %c0_38] : memref<1x16x1x16xf32, #tpu.memory_space<vmem>>, vector<1x16x1x16xf32>
    %47 = vector.shape_cast %46 : vector<1x16x1x16xf32> to vector<16x16xf32>
    %c0_39 = arith.constant 0 : index
    %c0_40 = arith.constant 0 : index
    %c0_41 = arith.constant 0 : index
    %c0_42 = arith.constant 0 : index
    %48 = vector.load %arg20[%c0_39, %c0_40, %c0_41, %c0_42] : memref<1x16x1x16xf32, #tpu.memory_space<vmem>>, vector<1x16x1x16xf32>
    %49 = vector.shape_cast %48 : vector<1x16x1x16xf32> to vector<16x16xf32>
    %50 = vector.broadcast %14 : vector<16x1xf32> to vector<16x16xf32>
    %51 = arith.mulf %47, %50 : vector<16x16xf32>
    %cst_43 = arith.constant dense<0.000000e+00> : vector<4x16xf32>
    %52 = tpu.matmul %17, %51, %cst_43 {dimension_numbers = #tpu.dot_dimension_numbers<[1], [0], [0], [1], [0, 0, 1, 1], [], []>} : vector<4x16xf32>, vector<16x16xf32>, vector<4x16xf32> -> vector<4x16xf32>
    %53 = vector.broadcast %18 : vector<4x1xf32> to vector<4x16xf32>
    %54 = arith.addf %52, %53 : vector<4x16xf32>
    %cst_44 = arith.constant 0.000000e+00 : f32
    %55 = vector.broadcast %cst_44 : f32 to vector<4x16xf32>
    %56 = arith.maximumf %54, %55 : vector<4x16xf32>
    %57 = vector.broadcast %14 : vector<16x1xf32> to vector<16x16xf32>
    %58 = arith.mulf %49, %57 : vector<16x16xf32>
    %cst_45 = arith.constant dense<0.000000e+00> : vector<4x16xf32>
    %59 = tpu.matmul %17, %58, %cst_45 {dimension_numbers = #tpu.dot_dimension_numbers<[1], [0], [0], [1], [0, 0, 1, 1], [], []>} : vector<4x16xf32>, vector<16x16xf32>, vector<4x16xf32> -> vector<4x16xf32>
    %60 = vector.broadcast %18 : vector<4x1xf32> to vector<4x16xf32>
    %61 = arith.addf %59, %60 : vector<4x16xf32>
    %cst_46 = arith.constant 0.000000e+00 : f32
    %62 = vector.broadcast %cst_46 : f32 to vector<4x16xf32>
    %63 = arith.maximumf %61, %62 : vector<4x16xf32>
    %64 = vector.broadcast %15 : vector<4x1xf32> to vector<4x16xf32>
    %65 = arith.mulf %56, %64 : vector<4x16xf32>
    %66 = vector.broadcast %42 : f32 to vector<4x16xf32>
    %67 = arith.mulf %65, %66 : vector<4x16xf32>
    %68 = vector.broadcast %15 : vector<4x1xf32> to vector<4x16xf32>
    %69 = arith.mulf %63, %68 : vector<4x16xf32>
    %70 = vector.broadcast %45 : f32 to vector<4x16xf32>
    %71 = arith.mulf %69, %70 : vector<4x16xf32>
    %cst_47 = arith.constant 0.000000e+00 : f32
    %72 = vector.broadcast %cst_47 : f32 to vector<4x1xf32>
    %73 = tpu.concatenate %72, %67, %30, %71, %72 in 1 : vector<4x1xf32>, vector<4x16xf32>, vector<4x128xf32>, vector<4x16xf32>, vector<4x1xf32> -> vector<4x162xf32>
    %c0_48 = arith.constant 0 : index
    %c0_49 = arith.constant 0 : index
    %74 = vector.load %arg13[%c0_48, %c0_49] : memref<1x128xf32, #tpu.memory_space<vmem>>, vector<1x128xf32>
    %c0_50 = arith.constant 0 : index
    %c0_51 = arith.constant 0 : index
    %75 = vector.load %arg14[%c0_50, %c0_51] : memref<1x128xf32, #tpu.memory_space<vmem>>, vector<1x128xf32>
    %76 = vector.extract_strided_slice %73 {offsets = [0, 0], sizes = [4, 128], strides = [1, 1]} : vector<4x162xf32> to vector<4x128xf32>
    %77 = vector.broadcast %74 : vector<1x128xf32> to vector<4x128xf32>
    %78 = arith.mulf %76, %77 : vector<4x128xf32>
    %79 = vector.extract_strided_slice %73 {offsets = [0, 1], sizes = [4, 128], strides = [1, 1]} : vector<4x162xf32> to vector<4x128xf32>
    %80 = vector.extract_strided_slice %73 {offsets = [0, 2], sizes = [4, 128], strides = [1, 1]} : vector<4x162xf32> to vector<4x128xf32>
    %81 = vector.broadcast %75 : vector<1x128xf32> to vector<4x128xf32>
    %82 = arith.mulf %80, %81 : vector<4x128xf32>
    %83 = vector.extract_strided_slice %73 {offsets = [0, 16], sizes = [4, 128], strides = [1, 1]} : vector<4x162xf32> to vector<4x128xf32>
    %84 = vector.broadcast %74 : vector<1x128xf32> to vector<4x128xf32>
    %85 = arith.mulf %83, %84 : vector<4x128xf32>
    %86 = vector.extract_strided_slice %73 {offsets = [0, 17], sizes = [4, 128], strides = [1, 1]} : vector<4x162xf32> to vector<4x128xf32>
    %87 = vector.extract_strided_slice %73 {offsets = [0, 18], sizes = [4, 128], strides = [1, 1]} : vector<4x162xf32> to vector<4x128xf32>
    %88 = vector.broadcast %75 : vector<1x128xf32> to vector<4x128xf32>
    %89 = arith.mulf %87, %88 : vector<4x128xf32>
    %90 = vector.extract_strided_slice %73 {offsets = [0, 32], sizes = [4, 128], strides = [1, 1]} : vector<4x162xf32> to vector<4x128xf32>
    %91 = vector.broadcast %74 : vector<1x128xf32> to vector<4x128xf32>
    %92 = arith.mulf %90, %91 : vector<4x128xf32>
    %93 = vector.extract_strided_slice %73 {offsets = [0, 33], sizes = [4, 128], strides = [1, 1]} : vector<4x162xf32> to vector<4x128xf32>
    %94 = vector.extract_strided_slice %73 {offsets = [0, 34], sizes = [4, 128], strides = [1, 1]} : vector<4x162xf32> to vector<4x128xf32>
    %95 = vector.broadcast %75 : vector<1x128xf32> to vector<4x128xf32>
    %96 = arith.mulf %94, %95 : vector<4x128xf32>
    %97 = tpu.concatenate %78, %79, %82, %85, %86, %89, %92, %93, %96 in 0 : vector<4x128xf32>, vector<4x128xf32>, vector<4x128xf32>, vector<4x128xf32>, vector<4x128xf32>, vector<4x128xf32>, vector<4x128xf32>, vector<4x128xf32>, vector<4x128xf32> -> vector<36x128xf32>
    %c0_52 = arith.constant 0 : index
    %c0_53 = arith.constant 0 : index
    %98 = vector.load %arg6[%c0_52, %c0_53] : memref<4x36xf32, #tpu.memory_space<vmem>>, vector<4x36xf32>
    %cst_54 = arith.constant dense<0.000000e+00> : vector<4x128xf32>
    %99 = tpu.matmul %98, %97, %cst_54 {dimension_numbers = #tpu.dot_dimension_numbers<[1], [0], [0], [1], [0, 0, 1, 1], [], []>} : vector<4x36xf32>, vector<36x128xf32>, vector<4x128xf32> -> vector<4x128xf32>
    %c0_55 = arith.constant 0 : index
    %c0_56 = arith.constant 0 : index
    %100 = vector.load %arg7[%c0_55, %c0_56] : memref<4x1xf32, #tpu.memory_space<vmem>>, vector<4x1xf32>
    %101 = vector.broadcast %100 : vector<4x1xf32> to vector<4x128xf32>
    %102 = arith.addf %99, %101 : vector<4x128xf32>
    %cst_57 = arith.constant 0.000000e+00 : f32
    %103 = vector.broadcast %cst_57 : f32 to vector<4x128xf32>
    %104 = arith.maximumf %102, %103 : vector<4x128xf32>
    %105 = vector.broadcast %16 : vector<4x1xf32> to vector<4x128xf32>
    %106 = arith.mulf %104, %105 : vector<4x128xf32>
    %c0_58 = arith.constant 0 : index
    %c0_59 = arith.constant 0 : index
    %c0_60 = arith.constant 0 : index
    %107 = vector.load %arg18[%c0_58, %c0_59, %c0_60] : memref<1x4x128xf32, #tpu.memory_space<vmem>>, vector<1x4x128xf32>
    %108 = vector.shape_cast %107 : vector<1x4x128xf32> to vector<4x128xf32>
    %109 = vector.shape_cast %106 : vector<4x128xf32> to vector<1x4x128xf32>
    tpu.vector_store %arg18[%c0_58, %c0_59, %c0_60], %109 {strides = array<i32>} : memref<1x4x128xf32, #tpu.memory_space<vmem>>, vector<1x4x128xf32>,
    %c0_61 = arith.constant 0 : index
    %c0_62 = arith.constant 0 : index
    %110 = vector.load %arg8[%c0_61, %c0_62] : memref<16x4xf32, #tpu.memory_space<vmem>>, vector<16x4xf32>
    %cst_63 = arith.constant dense<0.000000e+00> : vector<16x128xf32>
    %111 = tpu.matmul %110, %106, %cst_63 {dimension_numbers = #tpu.dot_dimension_numbers<[1], [0], [0], [1], [0, 0, 1, 1], [], []>} : vector<16x4xf32>, vector<4x128xf32>, vector<16x128xf32> -> vector<16x128xf32>
    %c0_64 = arith.constant 0 : index
    %c0_65 = arith.constant 0 : index
    %112 = vector.load %arg9[%c0_64, %c0_65] : memref<16x1xf32, #tpu.memory_space<vmem>>, vector<16x1xf32>
    %113 = vector.broadcast %112 : vector<16x1xf32> to vector<16x128xf32>
    %114 = arith.addf %111, %113 : vector<16x128xf32>
    %115 = arith.addf %114, %13 : vector<16x128xf32>
    %cst_66 = arith.constant 0.000000e+00 : f32
    %116 = vector.broadcast %cst_66 : f32 to vector<16x128xf32>
    %117 = arith.maximumf %115, %116 : vector<16x128xf32>
    %c0_67 = arith.constant 0 : index
    %c0_68 = arith.constant 0 : index
    %c0_69 = arith.constant 0 : index
    %118 = vector.load %arg15[%c0_67, %c0_68, %c0_69] : memref<1x16x128xf32, #tpu.memory_space<vmem>>, vector<1x16x128xf32>
    %119 = vector.shape_cast %118 : vector<1x16x128xf32> to vector<16x128xf32>
    %120 = vector.shape_cast %117 : vector<16x128xf32> to vector<1x16x128xf32>
    tpu.vector_store %arg15[%c0_67, %c0_68, %c0_69], %120 {strides = array<i32>} : memref<1x16x128xf32, #tpu.memory_space<vmem>>, vector<1x16x128xf32>,
    return
  }
  func.func @transform_0(%arg0: i32, %arg1: i32) -> (i32, i32, i32) {
    %c0_i32 = arith.constant 0 : i32
    %c0_i32_0 = arith.constant 0 : i32
    return %arg0, %c0_i32, %arg1 : i32, i32, i32
  }
  func.func @transform_2(%arg0: i32, %arg1: i32) -> (i32, i32) {
    %c0_i32 = arith.constant 0 : i32
    %c0_i32_0 = arith.constant 0 : i32
    %c0_i32_1 = arith.constant 0 : i32
    return %c0_i32, %c0_i32_0 : i32, i32
  }
  func.func @transform_3(%arg0: i32, %arg1: i32) -> (i32, i32) {
    %c0_i32 = arith.constant 0 : i32
    %c0_i32_0 = arith.constant 0 : i32
    %c0_i32_1 = arith.constant 0 : i32
    return %c0_i32, %c0_i32_0 : i32, i32
  }
  func.func @transform_4(%arg0: i32, %arg1: i32) -> (i32, i32) {
    %c0_i32 = arith.constant 0 : i32
    %c0_i32_0 = arith.constant 0 : i32
    %c0_i32_1 = arith.constant 0 : i32
    return %c0_i32, %c0_i32_0 : i32, i32
  }
  func.func @transform_5(%arg0: i32, %arg1: i32) -> (i32, i32) {
    %c0_i32 = arith.constant 0 : i32
    %c0_i32_0 = arith.constant 0 : i32
    %c0_i32_1 = arith.constant 0 : i32
    return %c0_i32, %c0_i32_0 : i32, i32
  }
  func.func @transform_6(%arg0: i32, %arg1: i32) -> (i32, i32) {
    %c0_i32 = arith.constant 0 : i32
    %c0_i32_0 = arith.constant 0 : i32
    %c0_i32_1 = arith.constant 0 : i32
    return %c0_i32, %c0_i32_0 : i32, i32
  }
  func.func @transform_7(%arg0: i32, %arg1: i32) -> (i32, i32) {
    %c0_i32 = arith.constant 0 : i32
    %c0_i32_0 = arith.constant 0 : i32
    %c0_i32_1 = arith.constant 0 : i32
    return %c0_i32, %c0_i32_0 : i32, i32
  }
  func.func @transform_8(%arg0: i32, %arg1: i32) -> (i32, i32) {
    %c0_i32 = arith.constant 0 : i32
    %c0_i32_0 = arith.constant 0 : i32
    %c0_i32_1 = arith.constant 0 : i32
    return %c0_i32, %c0_i32_0 : i32, i32
  }
  func.func @transform_9(%arg0: i32, %arg1: i32) -> (i32, i32) {
    %c0_i32 = arith.constant 0 : i32
    %c0_i32_0 = arith.constant 0 : i32
    %c0_i32_1 = arith.constant 0 : i32
    return %c0_i32, %c0_i32_0 : i32, i32
  }
  func.func @transform_10(%arg0: i32, %arg1: i32) -> (i32, i32) {
    %c0_i32 = arith.constant 0 : i32
    %c0_i32_0 = arith.constant 0 : i32
    %c0_i32_1 = arith.constant 0 : i32
    return %c0_i32, %c0_i32_0 : i32, i32
  }
  func.func @transform_11(%arg0: i32, %arg1: i32) -> (i32, i32) {
    %c0_i32 = arith.constant 0 : i32
    %c0_i32_0 = arith.constant 0 : i32
    %c0_i32_1 = arith.constant 0 : i32
    return %c0_i32, %c0_i32_0 : i32, i32
  }
  func.func @transform_12(%arg0: i32, %arg1: i32) -> (i32, i32) {
    %c0_i32 = arith.constant 0 : i32
    %c0_i32_0 = arith.constant 0 : i32
    %c0_i32_1 = arith.constant 0 : i32
    return %c0_i32, %c0_i32_0 : i32, i32
  }
  func.func @transform_13(%arg0: i32, %arg1: i32) -> (i32, i32, i32) {
    %c0_i32 = arith.constant 0 : i32
    %c0_i32_0 = arith.constant 0 : i32
    return %arg0, %c0_i32, %arg1 : i32, i32, i32
  }
  func.func @transform_14(%arg0: i32, %arg1: i32) -> (i32, i32, i32) {
    %c0_i32 = arith.constant 0 : i32
    %c0_i32_0 = arith.constant 0 : i32
    return %arg0, %c0_i32, %arg1 : i32, i32, i32
  }
  func.func @transform_15(%arg0: i32, %arg1: i32) -> (i32, i32, i32) {
    %c0_i32 = arith.constant 0 : i32
    %c0_i32_0 = arith.constant 0 : i32
    return %arg0, %c0_i32, %arg1 : i32, i32, i32
  }
  func.func @transform_16(%arg0: i32, %arg1: i32) -> (i32, i32, i32) {
    %c0_i32 = arith.constant 0 : i32
    %c0_i32_0 = arith.constant 0 : i32
    return %arg0, %c0_i32, %arg1 : i32, i32, i32
  }
}

</mosaic_0001>

<bundles_post_ra>
// kernel: tpu_custom_call.1
= control target key start
LH: loop header
LB: loop body
LE: loop exit
PB: predicated region body
PF: predicated region fallthrough
CT: control target
= control target key end

     0   :  { %s3046_s0 = inlined_call_operand.vmem [shape: f32[2,16,256], index: 0, kind: input, shape index: {}]   ;;  %s3047_s1 = inlined_call_operand.hbm [shape: f32[2,16,16,16], index: 1, kind: input, shape index: {}]   ;;  %s3048_s2 = inlined_call_operand.vmem [shape: f32[4,16], index: 2, kind: input, shape index: {}]   ;;  %s3049_s3 = inlined_call_operand.vmem [shape: f32[4,1], index: 3, kind: input, shape index: {}]   ;;  %s3050_s4 = inlined_call_operand.vmem [shape: f32[4,36], index: 4, kind: input, shape index: {}]   ;;  %s3051_s5 = inlined_call_operand.vmem [shape: f32[4,1], index: 5, kind: input, shape index: {}]   ;;  %s3052_s6 = inlined_call_operand.vmem [shape: f32[16,4], index: 6, kind: input, shape index: {}]   ;;  %s3053_s7 = inlined_call_operand.vmem [shape: f32[16,1], index: 7, kind: input, shape index: {}]   ;;  %s3054_s8 = inlined_call_operand.vmem [shape: f32[16,1], index: 8, kind: input, shape index: {}]   ;;  %s3055_s9 = inlined_call_operand.vmem [shape: f32[4,1], index: 9, kind: input, shape index: {}]   ;;  %s3056_s10 = inlined_call_operand.vmem [shape: f32[4,1], index: 10, kind: input, shape index: {}]   ;;  %s3057_s11 = inlined_call_operand.vmem [shape: f32[1,128], index: 11, kind: input, shape index: {}]   ;;  %s3058_s12 = inlined_call_operand.vmem [shape: f32[1,128], index: 12, kind: input, shape index: {}]   ;;  %s3059_s13 = inlined_call_operand.hbm [shape: f32[2,16,256], index: 13, kind: output, shape index: {0}]   ;;  %s3060_s14 = inlined_call_operand.hbm [shape: f32[2,16,256], index: 14, kind: output, shape index: {1}]   ;;  %s3061_s15 = inlined_call_operand.hbm [shape: f32[2,4,256], index: 15, kind: output, shape index: {2}]   ;;  %s3062_s16 = inlined_call_operand.hbm [shape: f32[2,4,256], index: 16, kind: output, shape index: {3}]  }
   0x1   :  { %3081 = sst [smem:[#allocation30_spill]] %s3046_s0 }
   0x2   :  { %3082 = sst [smem:[#allocation31_spill]] %s3047_s1 }
   0x3   :  { %3083 = sst [smem:[#allocation32_spill]] %s3048_s2 }
   0x4   :  { %3084 = sst [smem:[#allocation33_spill]] %s3049_s3 }
   0x5   :  { %3085 = sst [smem:[#allocation34_spill]] %s3050_s4 }
   0x6   :  { %3086 = sst [smem:[#allocation35_spill]] %s3054_s8 }
   0x7   :  { %3087 = sst [smem:[#allocation36_spill]] %s3055_s9 }
   0x8   :  { %3088 = sst [smem:[#allocation37_spill]] %s3056_s10 }
   0x9   :  { %3089 = sst [smem:[#allocation38_spill]] %s3059_s13 }
   0xa   :  { %3090 = sst [smem:[#allocation39_spill]] %s3060_s14 }
   0xb   :  { %3091 = sst [smem:[#allocation40_spill]] %s3061_s15 }
   0xc   :  { %3092 = sst [smem:[#allocation41_spill]] %s3062_s16 }
   0xd   :  { %22 = vsyncpa [#allocation7], 0 }
   0xe   :  { %24 = vsyncpa [#allocation7 + $0x1], 0 }
   0xf   :  { %25 = vsyncpa [#allocation9], 0 }
  0x10   :  { %27 = vsyncpa [#allocation9 + $0x1], 0 }
  0x11   :  { %28 = vsyncpa [#allocation12], 0 }
  0x12   :  { %30 = vsyncpa [#allocation12 + $0x1], 0  ;;  %s2491_s21 = smov 0   ;;  %s2493_s22 = smov 0  }
  0x13   :  { %s2495_s23 = smov 0   ;;  %s2497_s24 = smov 0  }
  0x14   :  { %s2499_s25 = smov 0   ;;  %s2501_s26 = smov 0  }
  0x15   :  { %s2503_s27 = smov 0   ;;  %s2505_s28 = smov 0  }
  0x16 LB: > { %3093 = sst [smem:[#allocation20_spill]] %s2347_s21  ;;  %s3069_s29 = sadd.s32 4294967295, %s2375_s28   ;;  %s2375_s28 = sphi %s2505_s28, %s36_s28   ;;  %s2371_s27 = sphi %s2503_s27, %s3134_s27   ;;  %s2367_s26 = sphi %s2501_s26, %s3133_s26   ;;  %s2363_s25 = sphi %s2499_s25, %s3132_s25   ;;  %s2359_s24 = sphi %s2497_s24, %s3131_s24   ;;  %s2355_s23 = sphi %s2495_s23, %s3130_s23   ;;  %s2351_s22 = sphi %s2493_s22, %s3129_s22   ;;  %s2347_s21 = sphi %s2491_s21, %s3128_s21  }
  0x17   : > { %3094 = sst [smem:[#allocation21_spill]] %s2351_s22  ;;  %s3068_s30 = sadd.s32 4294967294, %s2375_s28  }
  0x18   : > { %3095 = sst [smem:[#allocation22_spill]] %s2355_s23  ;;  %s45_s0 = sadd.s32 1, %s2367_s26 }
  0x19   : > { %3096 = sst [smem:[#allocation23_spill]] %s2367_s26  ;;  %p46_p0 = scmp.ge.s32.totalorder %s45_s0, 2 }
  0x1a   : > { %3097 = sst [smem:[#allocation24_spill]] %s2371_s27  ;;  %s48_s17 = sadd.s32 1, %s2371_s27 }
  0x1b   : > { %p64_p1 = scmp.ne.s32.totalorder %s2355_s23, %s2351_s22  ;;  %p65_p2 = scmp.eq.s32.totalorder %s2375_s28, 0 }
  0x1c   : > { %s3136_s0 = smov (%p46_p0, %s45_s0), 0  ;;  %s3138_s17 = smov (!%p46_p0, %s48_s17), %s2371_s27 }
  0x1d   : > { %3098 = sst [smem:[#allocation25_spill]] %s3136_s0  ;;  %s53_s18 = ssub.s32 %s2367_s26, %s3136_s0 }
  0x1e   : > { %p2543_p3 = por %p65_p2, %p64_p1  ;;  %p50_p4 = scmp.ge.s32.totalorder %s3138_s17, 2 }
  0x1f   : > { %p327_p5 = scmp.eq.s32.totalorder %s3069_s29, 3  ;;  %p332_p6 = scmp.ne.s32.totalorder %s2351_s22, %s2347_s21 }
  0x20   : > { %p333_p7 = scmp.eq.s32.totalorder %s3068_s30, 3  ;;  %s3140_s17 = smov (%p50_p4, %s3138_s17), 0 }
  0x21   : > { %3100 = sst [smem:[#allocation26_spill]] %s3140_s17  ;;  %p2555_p8 = por %p327_p5, %p64_p1 }
  0x22   : > { %p2559_p9 = por %p333_p7, %p332_p6  ;;  %s52_s0 = ssub.s32 %s2371_s27, %s3140_s17 }
  0x23   : > { %s3101_s20 = scalar_select %p2555_p8, 1, 0 }
  0x24   : > { %s3103_s13 = scalar_select %p2559_p9, 1, 0 }
  0x25   : > { %3102 = sst [smem:[#allocation27_spill]] %s3101_s20  ;;  %s54_s16 = sor.u32 %s53_s18, %s52_s0 }
  0x26   : > { %3104 = sst [smem:[#allocation28_spill]] %s3103_s13  ;;  %s57_s15 = sadd.s32 1, %s2355_s23 }
  0x27   : > { %p55_p10 = scmp.eq.s32.totalorder %s54_s16, 0  ;;  %p1871_p11 = scmp.ge.s32.totalorder %s2375_s28, 4 }
  0x29   : > { %s2567_s14 = scalar_select %p55_p10, %s2355_s23, %s57_s15  }
  0x2a   : > { %466 = sbr.rel (%p1871_p11) target bundleno = 60 (0x3c), region = 60 }
  0x2b   : > { %3105 = sst [smem:[#allocation29_spill]] %s2567_s14 }
  0x31   : > { %469 = sbr.rel (!%p2543_p3) target bundleno = 60 (0x3c), region = 64  ;;  %s471_s30 = sand.u32 (%p2543_p3), 1, %s2355_s23  }
  0x32   : > { %s1873_s29 = sshll.u32 (%p2543_p3), %s2371_s27, 2  ;;  %s1872_s21 = sshll.u32 (%p2543_p3), %s471_s30, 4 }
  0x33   : > { %s475_s20 = sadd.s32 (%p2543_p3), %s2367_s26, %s1873_s29  ;;  %s3106_s18 = sld [smem:[#allocation30_spill]] (%p2543_p3) }
  0x34   : > { %s1874_s13 = sshll.u32 (%p2543_p3), %s475_s20, 3  ;;  %s473_s15 = scalar_lea.vmem (%p2543_p3), [#allocation5], %s1872_s21 }
  0x39   : > { %s477_s16 = scalar_lea.vmem %s3106_s18, %s1874_s13 }
  0x3a   : > { %v507_v0 = vld [vmem:[%s477_s16] sm:$0xff]  ;;  %v509_v1 = vld [vmem:[%s477_s16 + $0x10] sm:$0xff] }
  0x3b   : > { %508 = vst [vmem:[%s473_s15] sm:$0xff] %v507_v0  ;;  %510 = vst [vmem:[%s473_s15 + $0x8] sm:$0xff] %v509_v1 }
  0x3c PF: > { %p1875_p12 = scmp.ge.s32.totalorder %s2375_s28, 1  ;;  %p515_p13 = scmp.lt.s32.totalorder %s2375_s28, 5 }
  0x3e   : > { %p516_p0 = pnand %p1875_p12, %p515_p13 }
  0x3f   : > { %s3107_s8 = sld [smem:[#allocation35_spill]] (!%p516_p0)  ;;  %s2584_s17 = sand.u32 (!%p516_p0), 1, %s2351_s22   ;;  %v2377_v3 = vmov (!%p516_p0), 0   ;;  %v2378_v6 = vmov (!%p516_p0), 0.0|0.0   ;;  %vm2379_vm0 = vmmov (!%p516_p0), 0   ;;  %v2380_v7 = vmov (!%p516_p0), 0.0  }
  0x40   : > { %519 = sbr.rel (%p516_p0) target bundleno = 1406 (0x57e), region = 102  ;;  %2098 = vset.pattern.permute.xlu0 (!%p516_p0), %v2377_v3  ;;  %s2588_s13 = sshll.u32 (!%p516_p0), %s2584_s17, 4  ;;  %2099 = vset.pattern.permute.xlu1 (!%p516_p0), %v2377_v3  ;;  %vm637_vm1 = vcmask (!%p516_p0), 130048  }
  0x41   : > { %s3108_s10 = sld [smem:[#allocation37_spill]] (!%p516_p0)  ;;  %1972 = vmatprep.subr.bf16.mxu0 (!%p516_p0), %v2378_v6  ;;  %1937 = vmatprep.mubr.msk.f32.mxu0 (!%p516_p0), %vm2379_vm0, %v2380_v7  ;;  %s3109_s3 = sld [smem:[#allocation33_spill]] (!%p516_p0) }
  0x42   : > { %s3110_s9 = sld [smem:[#allocation36_spill]] (!%p516_p0)  ;;  %s524_s19 = scalar_lea.vmem (!%p516_p0), [#allocation5], %s2588_s13 }
  0x43   : > { %v2610_v10 = vld [vmem:[%s524_s19] sm:$0xff] (!%p516_p0)  ;;  %v2616_v13 = vld [vmem:[%s524_s19 + $0x8] sm:$0xff] (!%p516_p0)  ;;  %s2619_s20 = scalar_lea.vmem (!%p516_p0), [#allocation8], %s2588_s13  ;;  %s3111_s2 = sld [smem:[#allocation32_spill]] (!%p516_p0) }
  0x44   : > { %s1881_s16 = sshll.u32 (!%p516_p0), %s2359_s24, 3  ;;  %s1884_s29 = sshll.u32 (!%p516_p0), %s2363_s25, 8 }
  0x45   : > { %v612_v2 = vld [vmem:[%s3107_s8] sm:$0xff] (!%p516_p0)  ;;  %v613_v4 = vld [vmem:[%s3107_s8 + $0x8] sm:$0xff] (!%p516_p0)  ;;  %s1882_s15 = sadd.s32 (!%p516_p0), 4294967295, %s1881_s16  ;;  %s1914_s30 = sadd.s32 (!%p516_p0), 8, %s1881_s16 }
  0x46   : > { %620 = vperm.xlu0 (!%p516_p0), %2098, %v612_v2   ;;  %p586_p1 = scmp.gt.s32.totalorder (!%p516_p0), %s1882_s15, 0  ;;  %p590_p2 = scmp.lt.s32.totalorder (!%p516_p0), %s1914_s30, 15 }
  0x47   : > { %v2598_v5 = vld [vmem:[%s3108_s10] sm:$0xf]  ;;  %s2381_s21 = smov [#allocation2]   ;;  %s3112_s1 = sld [smem:[#allocation31_spill]] }
  0x48   : > { %v617_v8 = vld [vmem:[%s3109_s3] sm:$0xf]  ;;  %s3142_s15 = smov (!%p586_p1, %s1882_s15), 0  ;;  %s3144_s30 = smov (!%p590_p2, %s1914_s30), 15 }
  0x49   : > { %634 = vperm.xlu1 %2099, %v617_v8   ;;  %v614_v9 = vld [vmem:[%s3110_s9] sm:$0xf]  ;;  %s593_s19 = sadd.s32 %s1884_s29, %s3142_s15  ;;  %s597_s3 = sshll.u32 %s2381_s21, 4  ;;  %s598_s3 = int_to_ptr.vmem [resolvable:$true] %s597_s3 }
  0x4a   : > { %625 = vperm.xlu0 %2098, %v613_v4   ;;  %v2630_v17 = vld [vmem:[%s3111_s2] sm:$0xf]  ;;  %s1885_s0 = sshll.u32 %s593_s19, 4 }
  0x4d   : > { %714 = vperm.xlu1 %2099, %v614_v9   ;;  %s595_s8 = scalar_lea.hbm %s3112_s1, %s1885_s0  ;;  %s2139_s16 = scalar_lea.hbm %s3112_s1, 8192 }
  0x4e   : > { %s2137_s9 = scalar_lea.hbm %s595_s8, 256  ;;  %p2140_p4 = scmp.lt.u32.totalorder %s595_s8, %s3112_s1 }
  0x4f   : > { %p2138_p3 = scmp.ne.s32.totalorder %s595_s8, %s2137_s9  ;;  %p2141_p5 = scmp.lt.u32.totalorder %s2139_s16, %s2137_s9 }
  0x50   : > { %p2143_p7 = scmp.lt.u32.totalorder %s2137_s9, %s595_s8 }
  0x51   : > { %p2142_p6 = por %p2141_p5, %p2140_p4 }
  0x53   : > { %p2144_p10 = por %p2143_p7, %p2142_p6 }
  0x55   : > { %p2145_p11 = pnand %p2144_p10, %p2138_p3 }
  0xc5   : > { %v2612_v11 = vpop.permute.xlu0 %620 }
  0xc6   : > { %v628_v12 = vmul.f32 %v2612_v11, %v2610_v10 }
  0xc8   : > { %630 = vst [vmem:[%s2619_s20] sm:$0xff] %v628_v12 }
  0xc9   : > { %v2622_v14 = vpop.permute.xlu0 %625 }
  0xca   : > { %v629_v15 = vmul.f32 %v2622_v14, %v2616_v13 }
  0xcc   : > { %631 = vst [vmem:[%s2619_s20 + $0x8] sm:$0xff] %v629_v15  ;;  %v1973_v16 = vpack.c.bf16 %v629_v15, %v628_v12 }
  0xce   : > { %1974 = vmatpush3.bf16.msra.mxu0 %v1973_v16 }
  0xd1   : > { %1938 = vmatmul.mubr.msk.f32.vlgmr.msra.gmra.mrb[0].mxu0 %vm637_vm1, %v2630_v17 }
  0xd2   : > { %2148 = shalt.err (!%p2145_p11)  }
  0xd3   : > { %s2149_s21 = scalar_lea.vmem %s598_s3, 256  ;;  %p2154_p13 = scmp.lt.s32.totalorder %s598_s3, %s598_s3 }
  0xd4   : > { %p2150_p12 = scmp.ne.s32.totalorder %s598_s3, %s2149_s21  ;;  %p2155_p0 = scmp.lt.s32.totalorder %s2149_s21, %s2149_s21 }
  0xd6   : > { %p2156_p1 = por %p2155_p0, %p2154_p13 }
  0xd8   : > { %p2157_p2 = pnand %p2156_p1, %p2150_p12 }
  0xda   : > { %2160 = shalt.err (!%p2157_p2)  }
  0xdb   : > { %s2382_s2 = smov 256   ;;  %s2383_s10 = smov 16  }
  0xdc   : > { %s2384_s27 = smov 1   ;;  %s601_s9 = sadd.s32 %s1884_s29, %s3144_s30 }
  0xdd   : > { %600 = dma.hbm_to_vmem [thread:$0]  %s595_s8, 256, %s598_s3, [#allocation4], %s2382_s2, %s2383_s10, %s2384_s27 }
  0xde   : > { %s1886_s14 = sshll.u32 %s601_s9, 4  ;;  %s2385_s26 = smov [#allocation3]  }
  0xdf   : > { %s606_s15 = sshll.u32 %s2385_s26, 4  ;;  %s603_s18 = scalar_lea.hbm %s3112_s1, %s1886_s14  ;;  %s607_s15 = int_to_ptr.vmem [resolvable:$true] %s606_s15 }
  0xe0   : > { %s2161_s21 = scalar_lea.hbm %s603_s18, 256  ;;  %p2164_p4 = scmp.lt.u32.totalorder %s603_s18, %s3112_s1 }
  0xe1   : > { %p2162_p3 = scmp.ne.s32.totalorder %s603_s18, %s2161_s21  ;;  %p2165_p5 = scmp.lt.u32.totalorder %s2139_s16, %s2161_s21 }
  0xe2   : > { %p2167_p7 = scmp.lt.u32.totalorder %s2161_s21, %s603_s18 }
  0xe3   : > { %p2166_p6 = por %p2165_p5, %p2164_p4 }
  0xe5   : > { %p2168_p10 = por %p2167_p7, %p2166_p6 }
  0xe7   : > { %p2169_p11 = pnand %p2168_p10, %p2162_p3 }
  0xe9   : > { %2172 = shalt.err (!%p2169_p11)  }
  0xea   : > { %s2173_s3 = scalar_lea.vmem %s607_s15, 256  ;;  %p2178_p13 = scmp.lt.s32.totalorder %s607_s15, %s607_s15 }
  0xeb   : > { %p2174_p12 = scmp.ne.s32.totalorder %s607_s15, %s2173_s3  ;;  %p2179_p0 = scmp.lt.s32.totalorder %s2173_s3, %s2173_s3 }
  0xed   : > { %p2180_p1 = por %p2179_p0, %p2178_p13 }
  0xef   : > { %p2181_p2 = pnand %p2180_p1, %p2174_p12 }
  0xf1   : > { %2184 = shalt.err (!%p2181_p2)  }
  0xf2   : > { %609 = dma.hbm_to_vmem [thread:$0]  %s603_s18, 256, %s607_s15, [#allocation4 + $0x1], %s2382_s2, %s2383_s10, %s2384_s27  ;;  %v2664_v18 = vpop.permute.xlu1 %634 }
  0xf3   : > { %s3113_s8 = sshll.u32 %s2584_s17, 2  ;;  %s2679_s23 = scalar_lea.vmem [#allocation6], %s2588_s13 }
  0xf4   : > { %s2674_s22 = scalar_lea.vmem [#allocation10], %s3113_s8  ;;  %s3114_s30 = smov %s3113_s8 }
  0xf5   : > { %s2683_s29 = scalar_lea.vmem [#allocation11], %s3114_s30 }
  0xf6   : > { %v2667_v23 = vpop.permute.xlu1 %714 }
 0x1a4   : > { %v707_v19 = vpop.f32.mrb[0].mxu0 }
 0x1a5   : > { %v708_v20 = vadd.f32 %v707_v19, %v2664_v18  ;;  %v1939_v21 = vpop.f32.mrb[1].mxu0 }
 0x1a7   : > { %v711_v22 = vmax.f32 %v708_v20, 0.0 }
 0x1a9   : > { %v2670_v24 = vmul.f32 %v2667_v23, %v711_v22 }
 0x1ab   : > { %718 = vst [vmem:[%s2674_s22] sm:$0xf] %v2670_v24 }
 0x1ac   : > { %2329 = dma.done.wait [#allocation4], 256 }
 0x1ad   : > { %2330 = vsyncadd [#allocation4], 4294967040 }
 0x1ae   : > { %2331 = dma.done.wait [#allocation4 + $0x1], 256 }
 0x1af   : > { %2332 = vsyncadd [#allocation4 + $0x1], 4294967040  ;;  %1975 = vmatprep.subr.bf16.mxu1 %v2378_v6  ;;  %1978 = vmatprep.subr.bf16.mxu0 %v2378_v6  ;;  %v764_v25 = vlaneseq  ;;  %v2386_v26 = vmov 1966171168   ;;  %v732_v42 = vld [vmem:[#allocation2] sm:$0x1] }
 0x1b0   : > { %v2687_v27 = vunpack.c.l.s4 %v2386_v26  ;;  %1944 = vmatprep.mubr.msk.f32.mxu1 %vm2379_vm0, %v2380_v7  ;;  %1951 = vmatprep.mubr.msk.f32.mxu0 %vm2379_vm0, %v2380_v7  ;;  %v733_v43 = vld [vmem:[#allocation2 + $0x1] sm:$0x1]  ;;  %v734_v44 = vld [vmem:[#allocation2 + $0x2] sm:$0x1]  ;;  %v735_v49 = vld [vmem:[#allocation2 + $0x3] sm:$0x1] }
 0x1b1   : > { %v2693_v28 = vshrl.u32 %v764_v25, 7  ;;  %2135 = vset.pattern.permute.xlu1 %v2377_v3  ;;  %2136 = vset.pattern.permute.xlu0 %v2377_v3  ;;  %v736_v50 = vld [vmem:[#allocation2 + $0x4] sm:$0x1]  ;;  %v737_v51 = vld [vmem:[#allocation2 + $0x5] sm:$0x1]  ;;  %s2387_s13 = smov 17  }
 0x1b2   : > { %v882_v29 = vunpack.c.0.s8 %v2687_v27  ;;  %v738_v56 = vld [vmem:[#allocation2 + $0x6] sm:$0x1]  ;;  %v739_v57 = vld [vmem:[#allocation2 + $0x7] sm:$0x1]  ;;  %v740_v58 = vld [vmem:[#allocation2 + $0x8] sm:$0x1]  ;;  %1261 = vrot.lane.b32.xlu0 %v2670_v24, %s2387_s13 }
 0x1b3   : > { %v766_v30 = vsub.s32 0, %v2693_v28  ;;  %v770_v31 = vsub.s32 1, %v2693_v28  ;;  %v774_v32 = vsub.s32 2, %v2693_v28  ;;  %v778_v33 = vsub.s32 3, %v2693_v28  ;;  %v741_v63 = vld [vmem:[#allocation2 + $0x9] sm:$0x1] }
 0x1b4   : > { %v782_v34 = vsub.s32 4, %v2693_v28  ;;  %v786_v35 = vsub.s32 5, %v2693_v28  ;;  %v790_v36 = vsub.s32 6, %v2693_v28  ;;  %v794_v37 = vsub.s32 7, %v2693_v28  ;;  %v742_v0 = vld [vmem:[#allocation2 + $0xa] sm:$0x1] }
 0x1b5   : > { %v767_v38 = vrot.slane %v2612_v11, %v766_v30  ;;  %v771_v39 = vrot.slane %v2612_v11, %v770_v31  ;;  %v775_v40 = vrot.slane %v2612_v11, %v774_v32  ;;  %v2710_v41 = vrot.slane %v2612_v11, %v778_v33  ;;  %v743_v1 = vld [vmem:[#allocation2 + $0xb] sm:$0x1]  ;;  %v744_v9 = vld [vmem:[#allocation2 + $0xc] sm:$0x1]  ;;  %v746_v12 = vld [vmem:[#allocation2 + $0xe] sm:$0x1] }
 0x1b6   : > { %v2713_v45 = vrot.slane %v2612_v11, %v782_v34  ;;  %v2716_v46 = vrot.slane %v2612_v11, %v786_v35  ;;  %v2719_v47 = vrot.slane %v2612_v11, %v790_v36  ;;  %v2722_v48 = vrot.slane %v2612_v11, %v794_v37  ;;  %v745_v11 = vld [vmem:[#allocation2 + $0xd] sm:$0x1]  ;;  %v747_v20 = vld [vmem:[#allocation2 + $0xf] sm:$0x1]  ;;  %v753_v27 = vld [vmem:[#allocation3 + $0x5] sm:$0x1] }
 0x1b7   : > { %v2725_v52 = vrot.slane %v2622_v14, %v766_v30  ;;  %v2728_v53 = vrot.slane %v2622_v14, %v770_v31  ;;  %v2731_v54 = vrot.slane %v2622_v14, %v774_v32  ;;  %v2734_v55 = vrot.slane %v2622_v14, %v778_v33  ;;  %p726_p3 = scmp.gt.s32.totalorder %s2359_s24, 0  ;;  %p729_p4 = scmp.lt.s32.totalorder %s2359_s24, 1 }
 0x1b8   : > { %v2737_v59 = vrot.slane %v2622_v14, %v782_v34  ;;  %v2740_v60 = vrot.slane %v2622_v14, %v786_v35  ;;  %v2743_v61 = vrot.slane %v2622_v14, %v790_v36  ;;  %v2746_v62 = vrot.slane %v2622_v14, %v794_v37  ;;  %v748_v34 = vld [vmem:[#allocation3] sm:$0x1]  ;;  %v749_v35 = vld [vmem:[#allocation3 + $0x1] sm:$0x1]  ;;  %v750_v36 = vld [vmem:[#allocation3 + $0x2] sm:$0x1] }
 0x1b9   : > { %v844_v2 = vmul.f32 %v767_v38, %v732_v42  ;;  %v845_v3 = vmul.f32 %v771_v39, %v733_v43  ;;  %v846_v4 = vmul.f32 %v775_v40, %v734_v44  ;;  %v847_v8 = vmul.f32 %v2710_v41, %v735_v49  ;;  %s727_s16 = scalar_select %p726_p3, 1, 0 }
 0x1ba   : > { %v848_v15 = vmul.f32 %v2713_v45, %v736_v50  ;;  %v849_v16 = vmul.f32 %v2716_v46, %v737_v51  ;;  %v850_v19 = vmul.f32 %v2719_v47, %v738_v56  ;;  %v851_v14 = vmul.f32 %v2722_v48, %v739_v57  ;;  %s730_s14 = scalar_select %p729_p4, 1, 0 }
 0x1bb   : > { %v852_v21 = vmul.f32 %v2725_v52, %v740_v58  ;;  %v853_v22 = vmul.f32 %v2728_v53, %v741_v63  ;;  %v854_v25 = vmul.f32 %v2731_v54, %v742_v0  ;;  %v855_v26 = vmul.f32 %v2734_v55, %v743_v1  ;;  %v751_v58 = vld [vmem:[#allocation3 + $0x3] sm:$0x1]  ;;  %v752_v63 = vld [vmem:[#allocation3 + $0x4] sm:$0x1]  ;;  %s728_s9 = scvt.s32.f32 %s727_s16  ;;  %s2388_s0 = smov 2  }
 0x1bc   : > { %v856_v30 = vmul.f32 %v2737_v59, %v744_v9  ;;  %v857_v31 = vmul.f32 %v2740_v60, %v745_v11  ;;  %v858_v32 = vmul.f32 %v2743_v61, %v746_v12  ;;  %v859_v33 = vmul.f32 %v2746_v62, %v747_v20  ;;  %s731_s19 = scvt.s32.f32 %s730_s14  ;;  %s2390_s3 = smov 18  }
 0x1bd   : > { %v876_v37 = vcombine.low %v844_v2, %v845_v3  ;;  %v877_v42 = vcombine.low %v846_v4, %v847_v8  ;;  %v878_v43 = vcombine.low %v848_v15, %v849_v16  ;;  %v879_v44 = vcombine.low %v850_v19, %v851_v14  ;;  %v757_v19 = vld [vmem:[#allocation3 + $0x9] sm:$0x1]  ;;  %v758_v14 = vld [vmem:[#allocation3 + $0xa] sm:$0x1]  ;;  %s2391_s8 = smov 34   ;;  %s2393_s30 = smov 127  }
 0x1be   : > { %v2764_v49 = vsub.s32 %v882_v29, %v2693_v28  ;;  %v925_v50 = vcombine.low %v852_v21, %v853_v22  ;;  %v926_v51 = vcombine.low %v854_v25, %v855_v26  ;;  %v927_v56 = vcombine.low %v856_v30, %v857_v31  ;;  %v754_v28 = vld [vmem:[#allocation3 + $0x6] sm:$0x1]  ;;  %v759_v26 = vld [vmem:[#allocation3 + $0xb] sm:$0x1]  ;;  %v760_v30 = vld [vmem:[#allocation3 + $0xc] sm:$0x1] }
 0x1bf   : > { %v928_v57 = vcombine.low %v858_v32, %v859_v33  ;;  %v1047_v0 = vmul.f32 %v767_v38, %v748_v34  ;;  %v1048_v1 = vmul.f32 %v771_v39, %v749_v35  ;;  %v1049_v9 = vmul.f32 %v775_v40, %v750_v36  ;;  %v755_v39 = vld [vmem:[#allocation3 + $0x7] sm:$0x1]  ;;  %v756_v40 = vld [vmem:[#allocation3 + $0x8] sm:$0x1]  ;;  %v761_v31 = vld [vmem:[#allocation3 + $0xd] sm:$0x1] }
 0x1c0   : > { %v886_v11 = vrot.slane %v876_v37, %v2764_v49  ;;  %v893_v2 = vrot.slane %v877_v42, %v2764_v49  ;;  %v900_v3 = vrot.slane %v878_v43, %v2764_v49  ;;  %v907_v4 = vrot.slane %v879_v44, %v2764_v49  ;;  %v762_v36 = vld [vmem:[#allocation3 + $0xe] sm:$0x1]  ;;  %v763_v37 = vld [vmem:[#allocation3 + $0xf] sm:$0x1]  ;;  %s2395_s16 = smov 112   ;;  %s2397_s14 = smov 110  }
 0x1c1   : > { %v935_v29 = vrot.slane %v925_v50, %v2764_v49  ;;  %v942_v8 = vrot.slane %v926_v51, %v2764_v49  ;;  %v949_v12 = vrot.slane %v927_v56, %v2764_v49  ;;  %v956_v38 = vrot.slane %v928_v57, %v2764_v49  ;;  %s2398_s26 = smov 94   ;;  %s3115_s4 = sld [smem:[#allocation34_spill]] }
 0x1c2   : > { %v908_v15 = vcombine.low %v886_v11, %v893_v2  ;;  %v909_v16 = vcombine.low %v900_v3, %v907_v4  ;;  %v1050_v20 = vmul.f32 %v2710_v41, %v751_v58  ;;  %v1051_v21 = vmul.f32 %v2713_v45, %v752_v63  ;;  %s1905_s21 = sshll.u32 %s2363_s25, 1 }
 0x1c3   : > { %v957_v22 = vcombine.low %v935_v29, %v942_v8  ;;  %v958_v25 = vcombine.low %v949_v12, %v956_v38  ;;  %v1052_v32 = vmul.f32 %v2716_v46, %v753_v27  ;;  %v1053_v33 = vmul.f32 %v2719_v47, %v754_v28 }
 0x1c4   : > { %v916_v34 = vrot.slane %v908_v15, %v2764_v49  ;;  %v923_v35 = vrot.slane %v909_v16, %v2764_v49  ;;  %v1054_v42 = vmul.f32 %v2722_v48, %v755_v39  ;;  %v1055_v41 = vmul.f32 %v2725_v52, %v756_v40 }
 0x1c5   : > { %v965_v45 = vrot.slane %v957_v22, %v2764_v49  ;;  %v972_v43 = vrot.slane %v958_v25, %v2764_v49  ;;  %v1056_v44 = vmul.f32 %v2728_v53, %v757_v19  ;;  %v1057_v46 = vmul.f32 %v2731_v54, %v758_v14 }
 0x1c6   : > { %v924_v50 = vcombine.low %v916_v34, %v923_v35  ;;  %v1058_v47 = vmul.f32 %v2734_v55, %v759_v26  ;;  %v1059_v51 = vmul.f32 %v2737_v59, %v760_v30  ;;  %v1060_v56 = vmul.f32 %v2740_v60, %v761_v31 }
 0x1c7   : > { %v973_v57 = vcombine.low %v965_v45, %v972_v43  ;;  %v1061_v48 = vmul.f32 %v2743_v61, %v762_v36  ;;  %v1062_v52 = vmul.f32 %v2746_v62, %v763_v37  ;;  %v1079_v58 = vcombine.low %v1047_v0, %v1048_v1  ;;  %v2824_v36 = vld [vmem:[%s3057_s11] ss:$0 sm:$0xff] }
 0x1c8   : > { %v1080_v63 = vcombine.low %v1049_v9, %v1050_v20  ;;  %v1081_v11 = vcombine.low %v1051_v21, %v1052_v32  ;;  %v1082_v2 = vcombine.low %v1053_v33, %v1054_v42  ;;  %v1128_v3 = vcombine.low %v1055_v41, %v1056_v44 }
 0x1c9   : > { %v1976_v53 = vpack.c.bf16 %v973_v57, %v924_v50  ;;  %v1089_v54 = vrot.slane %v1079_v58, %v2764_v49  ;;  %v1129_v4 = vcombine.low %v1057_v46, %v1058_v47  ;;  %v1130_v27 = vcombine.low %v1059_v51, %v1060_v56 }
 0x1ca   : > { %v1096_v55 = vrot.slane %v1080_v63, %v2764_v49  ;;  %v1103_v59 = vrot.slane %v1081_v11, %v2764_v49  ;;  %v1110_v60 = vrot.slane %v1082_v2, %v2764_v49  ;;  %v1131_v28 = vcombine.low %v1061_v48, %v1062_v52 }
 0x1cb   : > { %1977 = vmatpush3.bf16.msra.mxu1 %v1976_v53  ;;  %v1138_v61 = vrot.slane %v1128_v3, %v2764_v49  ;;  %v1145_v62 = vrot.slane %v1129_v4, %v2764_v49  ;;  %v1152_v0 = vrot.slane %v1130_v27, %v2764_v49  ;;  %v1251_v26 = vstv %s728_s9  ;;  %s2396_s9 = smov 96  }
 0x1cc   : > { %v1111_v1 = vcombine.low %v1089_v54, %v1096_v55  ;;  %v1112_v9 = vcombine.low %v1103_v59, %v1110_v60  ;;  %v1159_v29 = vrot.slane %v1131_v28, %v2764_v49  ;;  %1981 = vmatprep.subr.bf16.mxu1 %v2378_v6  ;;  %v1254_v34 = vstv %s731_s19  ;;  %s3117_s19 = sadd.s32 4294967295, %s2375_s28  }
 0x1cd   : > { %v1160_v8 = vcombine.low %v1138_v61, %v1145_v62  ;;  %vm1268_vm2 = vcmask 7168   ;;  %vm1270_vm3 = vcmask 138240   ;;  %vm1273_vm4 = vcmask 269312  }
 0x1ce   : > { %v1119_v12 = vrot.slane %v1111_v1, %v2764_v49  ;;  %v1126_v38 = vrot.slane %v1112_v9, %v2764_v49  ;;  %v1161_v39 = vcombine.low %v1152_v0, %v1159_v29  ;;  %1945 = vmatmul.mubr.msk.f32.vlgmr.msra.gmra.mrb[0].mxu1 %vm637_vm1, %v2630_v17  ;;  %v1393_v29 = vld [vmem:[%s3051_s5] sm:$0xf]  ;;  %vm1322_vm5 = vcmask 1039360  }
 0x1cf   : > { %v1168_v40 = vrot.slane %v1160_v8, %v2764_v49  ;;  %1964 = vmatprep.mubr.msk.f32.mxu1 %vm2379_vm0, %v2380_v7  ;;  %vm1331_vm6 = vcmask 1031168   ;;  %vm1342_vm7 = vcmask 916480   ;;  %vm1387_vm8 = vcmask 1043456  }
 0x1d0   : > { %v1127_v15 = vcombine.low %v1119_v12, %v1126_v38  ;;  %v1175_v16 = vrot.slane %v1161_v39, %v2764_v49  ;;  %v1485_v12 = vld [vmem:[%s3053_s7] sm:$0xff]  ;;  %v1486_v38 = vld [vmem:[%s3053_s7 + $0x8] sm:$0xff]  ;;  %vm1360_vm9 = vcmask 900096   ;;  %vm1349_vm10 = vcmask 908288  }
 0x1d1   : > { %vm1369_vm11 = vcmask 785408   ;;  %vm1376_vm12 = vcmask 777216   ;;  %vm1385_vm13 = vcmask 769024   ;;  %vm1399_vm14 = vcmask 293888  }
 0x1d2   : > { %v1176_v19 = vcombine.low %v1168_v40, %v1175_v16  ;;  %vm1497_vm15 = vcmask 31744  }
 0x1d4   : > { %v1979_v14 = vpack.c.bf16 %v1176_v19, %v1127_v15 }
 0x1d6   : > { %1980 = vmatpush3.bf16.msra.mxu0 %v1979_v14 }
 0x1d9   : > { %1952 = vmatmul.mubr.msk.f32.vlgmr.msra.gmra.mrb[2].mxu0 %vm637_vm1, %v2630_v17  ;;  %v1891_v17 = vld [vmem:[%s3058_s12] ss:$0 sm:$0xff] }
 0x2a1   : > { %v1042_v20 = vpop.f32.mrb[0].mxu1 }
 0x2a2   : > { %v1043_v21 = vadd.f32 %v1042_v20, %v2664_v18  ;;  %v1946_v22 = vpop.f32.mrb[1].mxu1 }
 0x2a4   : > { %v1046_v25 = vmax.f32 %v1043_v21, 0.0 }
 0x2a6   : > { %v1250_v49 = vmul.f32 %v1046_v25, %v2667_v23 }
 0x2a8   : > { %v1252_v30 = vmul.f32 %v1251_v26, %v1250_v49 }
 0x2aa   : > { %1257 = vrot.lane.b32.xlu0 %v1252_v30, %s2384_s27  ;;  %s2389_s27 = smov 32  }
 0x2ac   : > { %v1245_v24 = vpop.f32.mrb[2].mxu0 }
 0x2ad   : > { %v1246_v31 = vadd.f32 %v1245_v24, %v2664_v18  ;;  %v1953_v32 = vpop.f32.mrb[3].mxu0  ;;  %v1262_v18 = vpop.permute.xlu0 %1261 }
 0x2ae   : > { %1289 = vrot.lane.b32.xlu0 %v1891_v17, %s2388_s0  ;;  %s2399_s0 = smov 95  }
 0x2af   : > { %v1249_v33 = vmax.f32 %v1246_v31, 0.0 }
 0x2b1   : > { %v1253_v35 = vmul.f32 %v1249_v33, %v2667_v23 }
 0x2b2   : > { %1304 = vrot.lane.b32.xlu0 %v2824_v36, %s2389_s27 }
 0x2b3   : > { %v1255_v37 = vmul.f32 %v1254_v34, %v1253_v35 }
 0x2b5   : > { %1265 = vrot.lane.b32.xlu1 %v1255_v37, %s2387_s13  ;;  %s2394_s13 = smov 126  }
 0x2b9   : > { %1294 = vrot.lane.b32.xlu1 %v2824_v36, %s2383_s10  ;;  %s2392_s10 = smov 111  }
 0x2bd   : > { %1299 = vrot.lane.b32.xlu1 %v1891_v17, %s2390_s3 }
 0x2c1   : > { %1309 = vrot.lane.b32.xlu1 %v1891_v17, %s2391_s8  ;;  %s3118_s8 = sld [smem:[#allocation39_spill]] }
 0x31c   : > { %v1258_v42 = vpop.permute.xlu0 %1257 }
 0x31d   : > { %v1269_v23 = vsel %vm1268_vm2, 0.0, %v1258_v42 }
 0x31e   : > { %v2829_v45 = vsel %vm1270_vm3, %v1269_v23, %v1262_v18 }
 0x31f   : > { %v1316_v50 = vrot.slane %v2829_v45, 4  ;;  %v1283_v49 = vmul.f32 %v2824_v36, %v2829_v45 }
 0x320   : > { %v1290_v41 = vpop.permute.xlu0 %1289 }
 0x321   : > { %v1292_v46 = vmul.f32 %v1290_v41, %v2829_v45 }
 0x324   : > { %v1305_v47 = vpop.permute.xlu0 %1304 }
 0x325   : > { %v1307_v58 = vmul.f32 %v1305_v47, %v2829_v45 }
 0x327   : > { %v1266_v43 = vpop.permute.xlu1 %1265 }
 0x328   : > { %v1272_v44 = vsel %vm1270_vm3, %v1262_v18, %v1266_v43 }
 0x329   : > { %v1274_v51 = vsel %vm1273_vm4, %v1272_v44, 0.0 }
 0x32a   : > { %v1293_v56 = vmul.f32 %v1290_v41, %v1274_v51  ;;  %v2100_v57 = vpack.i.bf16 %v1274_v51, %v2829_v45  ;;  %v1317_v48 = vrot.slane %v1274_v51, 4  ;;  %v1308_v63 = vmul.f32 %v1305_v47, %v1274_v51 }
 0x32b   : > { %v1295_v52 = vpop.permute.xlu1 %1294 }
 0x32c   : > { %v1297_v11 = vmul.f32 %v1295_v52, %v2829_v45  ;;  %v1298_v2 = vmul.f32 %v1295_v52, %v1274_v51  ;;  %v2110_v3 = vpack.i.bf16 %v1293_v56, %v1292_v46  ;;  %2101 = vrot.lane.b32.xlu1 %v2100_v57, %s2392_s10  ;;  %v2105_v53 = vpack.i.bf16 %v1317_v48, %v1316_v50 }
 0x32d   : > { %v2115_v60 = vpack.i.bf16 %v1308_v63, %v1307_v58  ;;  %v1483_v58 = vld [vmem:[%s3052_s6] sm:$0xff] }
 0x32e   : > { %v1336_v54 = vrot.slane %v1297_v11, 4  ;;  %v1337_v4 = vrot.slane %v1298_v2, 4  ;;  %2106 = vrot.lane.b32.xlu0 %v2105_v53, %s2393_s30  ;;  %1969 = vmatprep.mubr.msk.f32.mxu0 %vm1497_vm15, %v1483_v58  ;;  %s1635_s30 = sshll.u32 %s2619_s20, 4  ;;  %s2887_s30 = int_to_ptr.vmem [resolvable:$true] %s1635_s30 }
 0x32f   : > { %v1300_v27 = vpop.permute.xlu1 %1299 }
 0x330   : > { %v1302_v55 = vmul.f32 %v1300_v27, %v2829_v45  ;;  %v1303_v59 = vmul.f32 %v1300_v27, %v1274_v51  ;;  %2111 = vrot.lane.b32.xlu1 %v2110_v3, %s2394_s13  ;;  %v2120_v28 = vpack.i.bf16 %v1337_v4, %v1336_v54  ;;  %v1484_v4 = vld [vmem:[%s3052_s6 + $0x8] sm:$0xff] }
 0x332   : > { %v1354_v61 = vrot.slane %v1302_v55, 4  ;;  %v1355_v62 = vrot.slane %v1303_v59, 4  ;;  %2121 = vrot.lane.b32.xlu0 %v2120_v28, %s2395_s16  ;;  %s2185_s16 = scalar_lea.vmem %s2887_s30, 256 }
 0x333   : > { %v1310_v0 = vpop.permute.xlu1 %1309  ;;  %p2186_p5 = scmp.ne.s32.totalorder %s2887_s30, %s2185_s16 }
 0x334   : > { %2116 = vrot.lane.b32.xlu1 %v2115_v60, %s2396_s9  ;;  %v2125_v1 = vpack.i.bf16 %v1355_v62, %v1354_v61  ;;  %v1312_v9 = vmul.f32 %v1310_v0, %v2829_v45  ;;  %v1313_v8 = vmul.f32 %v1310_v0, %v1274_v51  ;;  %s2400_s9 = smov [#allocation8]  }
 0x335   : > { %p2187_p6 = pnand %p2186_p5, %p2555_p8 }
 0x336   : > { %2126 = vrot.lane.b32.xlu0 %v2125_v1, %s2397_s14 }
 0x337   : > { %p2188_p7 = pneg %p2187_p6 }
 0x338   : > { %1381 = vrot.lane.b32.xlu1 %v1312_v9, %s2398_s26 }
 0x33a   : > { %2131 = vrot.lane.b32.xlu0 %v2105_v53, %s2399_s0  ;;  %s2875_s0 = sand.u32 1, %s3117_s19  }
 0x33b   : > { %s1594_s13 = scalar_lea.sflag [#allocation9], %s2875_s0 }
 0x33c   : > { %1396 = vperm.xlu1 %2135, %v1393_v29  }
 0x33e   : > { %1383 = vrot.lane.b32.xlu0 %v1313_v8, %s2398_s26  ;;  %s1901_s26 = sshll.u32 %s2363_s25, 2 }
 0x33f   : > { %s2871_s15 = sadd.s32 %s2359_s24, %s1901_s26  ;;  %s2189_s26 = sshll.u32 %s2400_s9, 4  ;;  %s2190_s26 = int_to_ptr.vmem [resolvable:$false] %s2189_s26 }
 0x340   : > { %1489 = vperm.xlu1 %2135, %v1485_v12   ;;  %s3079_s18 = sshll.u32 %s2871_s15, 7  ;;  %s2191_s19 = scalar_lea.vmem %s2190_s26, 512 }
 0x341   : > { %s2884_s10 = scalar_lea.hbm %s3118_s8, %s3079_s18  ;;  %p2192_p10 = scmp.lt.s32.totalorder %s2887_s30, %s2190_s26 }
 0x342   : > { %1478 = vperm.xlu0 %2136, %v2598_v5   ;;  %p2193_p11 = scmp.lt.s32.totalorder %s2191_s19, %s2185_s16 }
 0x344   : > { %1494 = vperm.xlu1 %2135, %v1486_v38   ;;  %p2194_p12 = por %p2193_p11, %p2192_p10 }
 0x346   : > { %p2195_p13 = pnand %p2194_p12, %p2188_p7 }
 0x39e   : > { %v2102_v39 = vpop.permute.xlu1 %2101 }
 0x39f   : > { %v2104_v37 = vunpack.i.h.bf16 %v2102_v39  ;;  %v2103_v18 = vunpack.i.l.bf16 %v2102_v39 }
 0x3a0   : > { %v2107_v40 = vpop.permute.xlu0 %2106 }
 0x3a1   : > { %v2109_v15 = vunpack.i.h.bf16 %v2107_v40  ;;  %v2108_v16 = vunpack.i.l.bf16 %v2107_v40  ;;  %v1350_v44 = vsel %vm1349_vm10, %v2103_v18, %v2104_v37 }
 0x3a2   : > { %v2112_v19 = vpop.permute.xlu1 %2111 }
 0x3a3   : > { %v2114_v14 = vunpack.i.h.bf16 %v2112_v19  ;;  %v2113_v20 = vunpack.i.l.bf16 %v2112_v19  ;;  %v1323_v22 = vsel %vm1322_vm5, %v2108_v16, %v2109_v15 }
 0x3a4   : > { %v2122_v21 = vpop.permute.xlu0 %2121  ;;  %v1388_v31 = vsel %vm1387_vm8, %v1283_v49, %v1323_v22 }
 0x3a5   : > { %v2124_v25 = vunpack.i.h.bf16 %v2122_v21  ;;  %v2123_v26 = vunpack.i.l.bf16 %v2122_v21  ;;  %v1332_v5 = vsel %vm1331_vm6, %v2113_v20, %v2114_v14 }
 0x3a6   : > { %v2117_v17 = vpop.permute.xlu1 %2116 }
 0x3a7   : > { %v1343_v30 = vsel %vm1342_vm7, %v2123_v26, %v2124_v25  ;;  %v2119_v42 = vunpack.i.h.bf16 %v2117_v17  ;;  %v2118_v23 = vunpack.i.l.bf16 %v2117_v17 }
 0x3a8   : > { %v2127_v24 = vpop.permute.xlu0 %2126  ;;  %v1389_v32 = vsel %vm1387_vm8, %v1332_v5, %v1343_v30 }
 0x3a9   : > { %v2129_v33 = vunpack.i.h.bf16 %v2127_v24  ;;  %v2128_v34 = vunpack.i.l.bf16 %v2127_v24  ;;  %v1982_v35 = vpack.c.bf16 %v1389_v32, %v1388_v31  ;;  %v1370_v46 = vsel %vm1369_vm11, %v2118_v23, %v2119_v42 }
 0x3aa   : > { %v1382_v48 = vpop.permute.xlu1 %1381 }
 0x3ab   : > { %1983 = vmatpush3.bf16.msra.mxu1 %v1982_v35  ;;  %v1361_v41 = vsel %vm1360_vm9, %v2128_v34, %v2129_v33 }
 0x3ac   : > { %v2132_v36 = vpop.permute.xlu0 %2131  ;;  %1984 = vmatprep.subr.bf16.mxu1 %v2378_v6  ;;  %v1390_v47 = vsel %vm1387_vm8, %v1350_v44, %v1361_v41  ;;  %v1392_v6 = vld [vmem:[%s3115_s4] sm:$0xf] }
 0x3ad   : > { %v2134_v45 = vunpack.i.h.bf16 %v2132_v36  ;;  %v2133_v43 = vunpack.i.l.bf16 %v2132_v36 }
 0x3af   : > { %v1377_v50 = vsel %vm1376_vm12, %v2133_v43, %v2134_v45 }
 0x3b0   : > { %v1391_v51 = vsel %vm1387_vm8, %v1370_v46, %v1377_v50  ;;  %v1384_v57 = vpop.permute.xlu0 %1383 }
 0x3b1   : > { %v1985_v56 = vpack.c.bf16 %v1391_v51, %v1390_v47  ;;  %v1386_v52 = vsel %vm1385_vm13, %v1382_v48, %v1384_v57 }
 0x3b3   : > { %1986 = vmatpush3.bf16.msra.mxu1 %v1985_v56 }
 0x3b4   : > { %1962 = vmatprep.subr.mxu1 %v2380_v7 }
 0x3b7   : > { %1963 = vmatpush3.msk.msra.mxu1 %vm1387_vm8, %v1386_v52 }
 0x3b8   : > { %1965 = vmatmul.mubr.msk.f32.vlgmr.msra.gmra.mrb[2].mxu1 %vm1399_vm14, %v1392_v6 }
 0x3bb   : > { %v1397_v7 = vpop.permute.xlu1 %1396 }
 0x3c1   : > { %v1479_v3 = vpop.permute.xlu0 %1478 }
 0x48b   : > { %v1471_v63 = vpop.f32.mrb[2].mxu1 }
 0x48c   : > { %v1472_v11 = vadd.f32 %v1471_v63, %v1397_v7  ;;  %v1966_v2 = vpop.f32.mrb[3].mxu1 }
 0x48e   : > { %v1475_v53 = vmax.f32 %v1472_v11, 0.0 }
 0x490   : > { %v1481_v54 = vmul.f32 %v1479_v3, %v1475_v53 }
 0x492   : > { %1482 = vst [vmem:[%s2683_s29] sm:$0xf] %v1481_v54  ;;  %1967 = vmatprep.subr.msk.mxu0 %vm1387_vm8, %v1481_v54 }
 0x493   : > { %1968 = vmatpush3.msk.msra.mxu0 %vm1387_vm8, %v1481_v54 }
 0x494   : > { %1970 = vmatmul.mubr.msk.f32.vlgmr.msra.gmra.mrb[4].mxu0 %vm1497_vm15, %v1484_v4 }
 0x495   : > { %2198 = shalt.err (!%p2195_p13)
}
 0x496   : > { %s2199_s20 = scalar_lea.hbm %s2884_s10, 256  ;;  %s2203_s9 = scalar_lea.hbm %s3118_s8, 1024 }
 0x497   : > { %p2200_p0 = scmp.ne.s32.totalorder %s2884_s10, %s2199_s20  ;;  %p2204_p3 = scmp.lt.u32.totalorder %s2884_s10, %s3118_s8 }
 0x498   : > { %p2205_p4 = scmp.lt.u32.totalorder %s2203_s9, %s2199_s20  ;;  %p2207_p6 = scmp.lt.u32.totalorder %s2199_s20, %s2884_s10 }
 0x499   : > { %p2201_p1 = pnand %p2200_p0, %p2555_p8 }
 0x49a   : > { %p2206_p5 = por %p2205_p4, %p2204_p3 }
 0x49b   : > { %p2202_p2 = pneg %p2201_p1 }
 0x49c   : > { %p2208_p7 = por %p2207_p6, %p2206_p5 }
 0x49e   : > { %p2209_p10 = pnand %p2208_p7, %p2202_p2 }
 0x4a0   : > { %2212 = shalt.err (!%p2209_p10)
}
 0x4a1   : > { %s3080_s16 = smov 128   ;;  %s2402_s19 = smov 8  }
 0x4a2   : > { %1988 = dma.vmem_to_hbm [thread:$0]  (%p2555_p8), %s2887_s30, 256, %s2884_s10, %s1594_s13, %s3080_s16, %s2382_s2, %s2402_s19  }
 0x4a3   : > { %s2919_s18 = sadd.s32 %s2359_s24, %s1905_s21  ;;  %s3119_s9 = sld [smem:[#allocation40_spill]] }
 0x4a4   : > { %s1906_s20 = sshll.u32 %s2919_s18, 6  ;;  %s1653_s1 = sshll.u32 %s2674_s22, 4  ;;  %s1654_s1 = int_to_ptr.vmem [resolvable:$true] %s1653_s1 }
 0x4a5   : > { %s2213_s4 = scalar_lea.vmem %s1654_s1, 64  ;;  %s2403_s10 = smov [#allocation10]  }
 0x4a6   : > { %p2214_p11 = scmp.ne.s32.totalorder %s1654_s1, %s2213_s4  ;;  %s2217_s25 = sshll.u32 %s2403_s10, 4  ;;  %s2218_s25 = int_to_ptr.vmem [resolvable:$false] %s2217_s25 }
 0x4a7   : > { %s2219_s24 = scalar_lea.vmem %s2218_s25, 128  ;;  %p2220_p0 = scmp.lt.s32.totalorder %s1654_s1, %s2218_s25 }
 0x4a8   : > { %p2215_p12 = pnand %p2214_p11, %p2555_p8  ;;  %p2221_p1 = scmp.lt.s32.totalorder %s2219_s24, %s2213_s4 }
 0x4a9   : > { %s2927_s26 = scalar_lea.hbm %s3119_s9, %s1906_s20 }
 0x4aa   : > { %p2216_p13 = pneg %p2215_p12  ;;  %p2222_p2 = por %p2221_p1, %p2220_p0 }
 0x4ac   : > { %p2223_p3 = pnand %p2222_p2, %p2216_p13 }
 0x4ae   : > { %2226 = shalt.err (!%p2223_p3)
}
 0x4af   : > { %s2227_s22 = scalar_lea.hbm %s2927_s26, 64  ;;  %s2231_s27 = scalar_lea.hbm %s3119_s9, 256 }
 0x4b0   : > { %p2228_p4 = scmp.ne.s32.totalorder %s2927_s26, %s2227_s22  ;;  %p2232_p7 = scmp.lt.u32.totalorder %s2927_s26, %s3119_s9 }
 0x4b1   : > { %p2233_p10 = scmp.lt.u32.totalorder %s2231_s27, %s2227_s22  ;;  %p2235_p12 = scmp.lt.u32.totalorder %s2227_s22, %s2927_s26 }
 0x4b2   : > { %p2229_p5 = pnand %p2228_p4, %p2555_p8 }
 0x4b3   : > { %p2234_p11 = por %p2233_p10, %p2232_p7 }
 0x4b4   : > { %p2230_p6 = pneg %p2229_p5 }
 0x4b5   : > { %p2236_p13 = por %p2235_p12, %p2234_p11 }
 0x4b7   : > { %p2237_p0 = pnand %p2236_p13, %p2230_p6 }
 0x4b9   : > { %2240 = shalt.err (!%p2237_p0)
}
 0x4ba   : > { %1989 = dma.vmem_to_hbm [thread:$0]  (%p2555_p8), %s1654_s1, 64, %s2927_s26, %s1594_s13  }
 0x4bb   : > { %s3120_s24 = sld [smem:[#allocation41_spill]]  ;;  %s1668_s22 = sshll.u32 %s2683_s29, 4  ;;  %s1669_s22 = int_to_ptr.vmem [resolvable:$true] %s1668_s22 }
 0x4bc   : > { %s1604_s27 = scalar_lea.sflag [#allocation12], %s2584_s17  ;;  %s2241_s3 = scalar_lea.vmem %s1669_s22, 64 }
 0x4bd   : > { %p2242_p1 = scmp.ne.s32.totalorder %s1669_s22, %s2241_s3  ;;  %s2404_s0 = smov [#allocation11]  }
 0x4be   : > { %s2245_s10 = sshll.u32 %s2404_s0, 4  ;;  %s2246_s10 = int_to_ptr.vmem [resolvable:$false] %s2245_s10 }
 0x4bf   : > { %p2243_p2 = pnand %p2242_p1, %p2555_p8  ;;  %s2247_s16 = scalar_lea.vmem %s2246_s10, 128 }
 0x4c0   : > { %p2248_p4 = scmp.lt.s32.totalorder %s1669_s22, %s2246_s10  ;;  %p2249_p5 = scmp.lt.s32.totalorder %s2247_s16, %s2241_s3 }
 0x4c1   : > { %s3121_s30 = smov %s3120_s24  ;;  %s2954_s21 = scalar_lea.hbm %s3120_s24, %s1906_s20 }
 0x4c2   : > { %p2244_p3 = pneg %p2243_p2  ;;  %p2250_p6 = por %p2249_p5, %p2248_p4 }
 0x4c4   : > { %p2251_p7 = pnand %p2250_p6, %p2244_p3 }
 0x4c6   : > { %2254 = shalt.err (!%p2251_p7)
}
 0x4c7   : > { %s2255_s1 = scalar_lea.hbm %s2954_s21, 64  ;;  %s2259_s18 = scalar_lea.hbm %s3121_s30, 256 }
 0x4c8   : > { %p2256_p10 = scmp.ne.s32.totalorder %s2954_s21, %s2255_s1  ;;  %p2260_p13 = scmp.lt.u32.totalorder %s2954_s21, %s3121_s30 }
 0x4c9   : > { %p2261_p0 = scmp.lt.u32.totalorder %s2259_s18, %s2255_s1  ;;  %p2263_p2 = scmp.lt.u32.totalorder %s2255_s1, %s2954_s21 }
 0x4ca   : > { %p2257_p11 = pnand %p2256_p10, %p2555_p8 }
 0x4cb   : > { %p2262_p1 = por %p2261_p0, %p2260_p13 }
 0x4cc   : > { %p2258_p12 = pneg %p2257_p11 }
 0x4cd   : > { %p2264_p3 = por %p2263_p2, %p2262_p1 }
 0x4cf   : > { %p2265_p4 = pnand %p2264_p3, %p2258_p12 }
 0x4d1   : > { %2268 = shalt.err (!%p2265_p4)
}
 0x4d2   : > { %1990 = dma.vmem_to_hbm [thread:$0]  (%p2555_p8), %s1669_s22, 64, %s2954_s21, %s1604_s27   ;;  %v1490_v27 = vpop.permute.xlu1 %1489 }
 0x4d3   : > { %s1618_s16 = sshll.u32 %s2679_s23, 4  ;;  %s3122_s4 = sshll.u32 %s2871_s15, 7  ;;  %s2985_s16 = int_to_ptr.vmem [resolvable:$true] %s1618_s16 }
 0x4d4   : > { %s3123_s3 = sld [smem:[#allocation38_spill]]  ;;  %s1589_s21 = scalar_lea.sflag [#allocation7], %s2584_s17 }
 0x4d5   : > { %s2269_s22 = scalar_lea.vmem %s2985_s16, 256  ;;  %s2405_s15 = smov [#allocation6]  }
 0x4d6   : > { %v1495_v55 = vpop.permute.xlu1 %1494  ;;  %p2270_p5 = scmp.ne.s32.totalorder %s2985_s16, %s2269_s22  ;;  %s2273_s27 = sshll.u32 %s2405_s15, 4  ;;  %s2274_s27 = int_to_ptr.vmem [resolvable:$false] %s2273_s27 }
 0x4d7   : > { %s2275_s10 = scalar_lea.vmem %s2274_s27, 512  ;;  %p2276_p10 = scmp.lt.s32.totalorder %s2985_s16, %s2274_s27 }
 0x4d8   : > { %p2271_p6 = pnand %p2270_p5, %p2555_p8  ;;  %p2277_p11 = scmp.lt.s32.totalorder %s2275_s10, %s2269_s22 }
 0x4da   : > { %s2983_s0 = scalar_lea.hbm %s3123_s3, %s3122_s4  ;;  %p2272_p7 = pneg %p2271_p6 }
 0x4db   : > { %p2278_p12 = por %p2277_p11, %p2276_p10 }
 0x4dd   : > { %p2279_p13 = pnand %p2278_p12, %p2272_p7 }
 0x567   : > { %v1971_v59 = vpop.f32.mrb[4].mxu0 }
 0x568   : > { %v1579_v60 = vadd.f32 %v1971_v59, %v1495_v55  ;;  %v1573_v28 = vpop.f32.mrb[5].mxu0 }
 0x569   : > { %v1574_v61 = vadd.f32 %v1573_v28, %v1490_v27 }
 0x56a   : > { %v1583_v62 = vadd.f32 %v1579_v60, %v2616_v13 }
 0x56b   : > { %v1582_v0 = vadd.f32 %v1574_v61, %v2610_v10 }
 0x56c   : > { %v1585_v1 = vmax.f32 %v1583_v62, 0.0 }
 0x56d   : > { %v1584_v9 = vmax.f32 %v1582_v0, 0.0 }
 0x56e   : > { %1587 = vst [vmem:[%s2679_s23 + $0x8] sm:$0xff] %v1585_v1 }
 0x56f   : > { %1586 = vst [vmem:[%s2679_s23] sm:$0xff] %v1584_v9 }
 0x570   : > { %2282 = shalt.err (!%p2279_p13)
}
 0x571   : > { %s2283_s23 = scalar_lea.hbm %s2983_s0, 256  ;;  %s2287_s13 = scalar_lea.hbm %s3123_s3, 1024 }
 0x572   : > { %p2284_p0 = scmp.ne.s32.totalorder %s2983_s0, %s2283_s23  ;;  %p2288_p3 = scmp.lt.u32.totalorder %s2983_s0, %s3123_s3 }
 0x573   : > { %p2289_p4 = scmp.lt.u32.totalorder %s2287_s13, %s2283_s23  ;;  %p2291_p6 = scmp.lt.u32.totalorder %s2283_s23, %s2983_s0 }
 0x574   : > { %p2285_p1 = pnand %p2284_p0, %p2555_p8 }
 0x575   : > { %p2290_p5 = por %p2289_p4, %p2288_p3 }
 0x576   : > { %p2286_p2 = pneg %p2285_p1 }
 0x577   : > { %p2292_p7 = por %p2291_p6, %p2290_p5 }
 0x579   : > { %p2293_p10 = pnand %p2292_p7, %p2286_p2 }
 0x57b   : > { %2296 = shalt.err (!%p2293_p10)
}
 0x57c   : > { %s3124_s26 = smov 128  }
 0x57d   : > { %1987 = dma.vmem_to_hbm [thread:$0]  (%p2555_p8), %s2985_s16, 256, %s2983_s0, %s1589_s21, %s3124_s26, %s2382_s2, %s2402_s19  }
 0x57e PF: > { %s3125_s4 = sld [smem:[#allocation20_spill]]  ;;  %p2008_p11 = scmp.ge.s32.totalorder %s2375_s28, 2 }
 0x580   : > { %p1996_p12 = pnand %p2008_p11, %p2559_p9 }
 0x584   : > { %s1680_s24 = sand.u32 1, %s3125_s4  }
 0x585   : > { %s1681_s22 = scalar_lea.sflag [#allocation7], %s1680_s24 }
 0x586   : > { %2334 = dma.done.wait (!%p1996_p12), %s1681_s22, 256  }
 0x587   : > { %2336 = vsyncadd (!%p1996_p12), %s1681_s22, 4294967040  ;;  %s3127_s14 = sadd.s32 4294967294, %s2375_s28  }
 0x588   : > { %s1689_s15 = sand.u32 1, %s3127_s14  }
 0x589   : > { %s1690_s27 = scalar_lea.sflag [#allocation9], %s1689_s15 }
 0x58a   : > { %2338 = dma.done.wait (!%p1996_p12), %s1690_s27, 320  }
 0x58b   : > { %2340 = vsyncadd (!%p1996_p12), %s1690_s27, 4294966976  ;;  %s1708_s17 = scalar_lea.sflag [#allocation12], %s1680_s24 }
 0x58c   : > { %2342 = dma.done.wait (!%p1996_p12), %s1708_s17, 64  }
 0x58d   : > { %2344 = vsyncadd (!%p1996_p12), %s1708_s17, 4294967232  ;;  %s36_s28 = sadd.s32 1, %s2375_s28   ;;  %s3128_s21 = sld [smem:[#allocation21_spill]] }
 0x58e   : > { %p33_p8 = scmp.ge.s32.totalorder %s36_s28, 6   ;;  %s3129_s22 = sld [smem:[#allocation22_spill]] }
 0x58f   : > { %s3130_s23 = sld [smem:[#allocation29_spill]]  ;;  %s3131_s24 = sld [smem:[#allocation23_spill]] }
 0x590   : > { %s3132_s25 = sld [smem:[#allocation24_spill]]  ;;  %s3133_s26 = sld [smem:[#allocation25_spill]] }
 0x591   : > { %s3134_s27 = sld [smem:[#allocation26_spill]]  ;;  %35 = sbr.rel (!%p33_p8) target bundleno = 22 (0x16), region = 199 }
 0x598   :  { %1713 = vsyncpa [#allocation7], 1 }
 0x599   :  { %1715 = vsyncpa [#allocation7 + $0x1], 1 }
 0x59a   :  { %1716 = vsyncpa [#allocation9], 1 }
 0x59b   :  { %1718 = vsyncpa [#allocation9 + $0x1], 1 }
 0x59c   :  { %1719 = vsyncpa [#allocation12], 1 }
 0x59d   :  { %1721 = vsyncpa [#allocation12 + $0x1], 1 }
 0x59e   :  { %1722 = vsyncmov [#allocation4] }
 0x5a1   :  { %s1723_s2 = vpop.sfrf %1722 }
 0x5a2   :  { %p1911_p9 = scmp.ne.s32.totalorder %s1723_s2, 0 }
 0x5a4   :  { %1727 = shalt.err (%p1911_p9)  }
 0x5a5   :  { %1729 = vsyncmov [#allocation4 + $0x1] }
 0x5a8   :  { %s1730_s19 = vpop.sfrf %1729 }
 0x5a9   :  { %p1912_p13 = scmp.ne.s32.totalorder %s1730_s19, 0 }
 0x5ab   :  { %1734 = shalt.err (%p1912_p13)  }

</bundles_post_ra>
